<compile_context>
chip_gen: v5e
topology: v5e:2x2
jax: 0.10.0
libtpu: 0.0.40
codegen_flags: <defaults>
</compile_context>

<pallas_src>
import math

import jax
import jax.numpy as jnp
from jax import lax
from jax.experimental import pallas as pl
from jax.experimental.pallas import tpu as pltpu


def _round_up(x, m):
    return ((x + m - 1) // m) * m


def _gelu_exact(x):
    # torch.nn.GELU() default (erf form).  TODO(synk): swap to tanh-approx GELU
    # (EUP-routed) if the accuracy budget allows (perf review, v6e).
    return 0.5 * x * (1.0 + lax.erf(x * jnp.float32(0.7071067811865476)))


# ------------------------------ Pallas kernel --------------------------------

def _patch_embed_kernel(p1_ref, w1_ref, b1_ref, w2_ref, b2_ref, w3_ref,
                        scale_ref, shift_ref, o_ref, a_scr, b_scr):
    """Fused conv1(s2)+GELU -> conv2+GELU -> conv3+BN for ONE image.

    p1_ref      : (1, S, K1)      bf16  im2col'ed conv1 patches (S = Ho*Wo)
    w1_ref      : (K1, Ep)        bf16
    w2_ref/w3_ref: (9, Ep, Ep)    bf16  tap index t = 3*dh + dw
    b*_ref      : (1, Ep)         f32
    scale/shift : (1, Ep)         f32   BN(eval) scale and (b3-folded) shift
    o_ref       : (1, Ho, Wo, Ep) f32
    a_scr/b_scr : (Ho+2, Wo+2, Ep) f32  zero-padded activation scratch (VMEM)
    """
    _, Ho, Wo, Ep = o_ref.shape
    S = Ho * Wo
    cdt = w2_ref.dtype

    # ---- conv1 (patches @ W1 + b1) + GELU, staged into padded scratch -------
    acc1 = jnp.dot(p1_ref[0], w1_ref[...], preferred_element_type=jnp.float32)
    y1 = _gelu_exact(acc1 + b1_ref[...])                        # (S, Ep) f32

    a_scr[...] = jnp.zeros_like(a_scr)                          # halo = conv zero pad
    a_scr[1:1 + Ho, 1:1 + Wo, :] = y1.reshape(Ho, Wo, Ep)

    # ---- conv2: nine shifted (S,Ep)@(Ep,Ep) dots + bias + GELU --------------
    acc2 = jnp.zeros((S, Ep), jnp.float32)
    for dh in range(3):
        for dw in range(3):
            tap = a_scr[dh:dh + Ho, dw:dw + Wo, :].reshape(S, Ep)
            acc2 = acc2 + jnp.dot(tap.astype(cdt), w2_ref[3 * dh + dw],
                                  preferred_element_type=jnp.float32)
    y2 = _gelu_exact(acc2 + b2_ref[...])                        # (S, Ep) f32

    b_scr[...] = jnp.zeros_like(b_scr)
    b_scr[1:1 + Ho, 1:1 + Wo, :] = y2.reshape(Ho, Wo, Ep)

    # ---- conv3 + fused bias / BatchNorm2d (eval) ----------------------------
    acc3 = jnp.zeros((S, Ep), jnp.float32)
    for dh in range(3):
        for dw in range(3):
            tap = b_scr[dh:dh + Ho, dw:dw + Wo, :].reshape(S, Ep)
            acc3 = acc3 + jnp.dot(tap.astype(cdt), w3_ref[3 * dh + dw],
                                  preferred_element_type=jnp.float32)
    y3 = acc3 * scale_ref[...] + shift_ref[...]
    o_ref[0] = y3.reshape(Ho, Wo, Ep).astype(o_ref.dtype)


# --------------------------------- wrapper -----------------------------------

def _im2col(x_nhwc, k, stride, pad):
    """(N,H,W,C) -> patches (N, Ho*Wo, k*k*C) with (dh, dw, c) ordering."""
    N, H, W, C = x_nhwc.shape
    xp = jnp.pad(x_nhwc, ((0, 0), (pad, pad), (pad, pad), (0, 0)))
    Ho = (H + 2 * pad - k) // stride + 1
    Wo = (W + 2 * pad - k) // stride + 1
    cols = []
    for dh in range(k):
        for dw in range(k):
            cols.append(
                xp[:, dh:dh + stride * Ho:stride, dw:dw + stride * Wo:stride, :])
    patches = jnp.stack(cols, axis=-2)            # (N, Ho, Wo, k*k, C)
    return patches.reshape(N, Ho * Wo, k * k * C), Ho, Wo


def _pad_last(a, ep):
    e = a.shape[-1]
    if e == ep:
        return a
    return jnp.pad(a, [(0, 0)] * (a.ndim - 1) + [(0, ep - e)])


def overlapping_patch_embed(x_nchw, params, *, compute_dtype=jnp.bfloat16):
    """Forward pass matching OverlappingPatchEmbed (BatchNorm in eval mode)."""
    x = jnp.transpose(x_nchw, (0, 2, 3, 1))                     # NCHW -> NHWC
    N, H, W, Cin = x.shape
    E = params["w1"].shape[-1]
    Ep = _round_up(E, 128)                                      # lane-dense channels

    # conv1 patches (only conv1 is im2col'ed; see header comment).
    p1, Ho, Wo = _im2col(x, 3, 2, 1)                            # (N, S, 9*Cin)
    S, K1 = Ho * Wo, 9 * Cin
    p1 = p1.astype(compute_dtype)

    w1 = _pad_last(params["w1"].reshape(K1, E), Ep).astype(compute_dtype)
    b1 = _pad_last(params["b1"], Ep)
    b2 = _pad_last(params["b2"], Ep)
    w2 = jnp.pad(params["w2"].reshape(9, E, E),
                 ((0, 0), (0, Ep - E), (0, Ep - E))).astype(compute_dtype)
    w3 = jnp.pad(params["w3"].reshape(9, E, E),
                 ((0, 0), (0, Ep - E), (0, Ep - E))).astype(compute_dtype)
    # Fold conv3 bias into the BN affine:  (y + b3)*s + t  ==  y*s + (b3*s + t)
    scale = _pad_last(params["bn_scale"], Ep)
    shift = _pad_last(params["b3"] * params["bn_scale"] + params["bn_shift"], Ep)

    # Scoped-VMEM budget: double-buffered blocks + resident weights + scratch,
    # 2x headroom, clamped for v7x's 64 MiB physical VMEM.
    cb = jnp.dtype(compute_dtype).itemsize
    est = (2 * S * K1 * cb + K1 * Ep * cb + 2 * 9 * Ep * Ep * cb
           + 4 * Ep * 4 + 2 * Ho * Wo * Ep * 4
           + 2 * (Ho + 2) * (Wo + 2) * Ep * 4)
    vmem_limit = int(min(64 * 2**20, max(32 * 2**20, 2 * est + (4 << 20))))

    row = pl.BlockSpec((1, Ep), lambda n: (0, 0))
    out = pl.pallas_call(
        _patch_embed_kernel,
        out_shape=jax.ShapeDtypeStruct((N, Ho, Wo, Ep), jnp.float32),
        grid=(N,),
        in_specs=[
            pl.BlockSpec((1, S, K1), lambda n: (n, 0, 0)),      # conv1 patches
            pl.BlockSpec((K1, Ep), lambda n: (0, 0)),           # W1 (resident)
            row,                                                # b1
            pl.BlockSpec((9, Ep, Ep), lambda n: (0, 0, 0)),     # W2 (resident)
            row,                                                # b2
            pl.BlockSpec((9, Ep, Ep), lambda n: (0, 0, 0)),     # W3 (resident)
            row, row,                                           # bn scale / shift
        ],
        out_specs=pl.BlockSpec((1, Ho, Wo, Ep), lambda n: (n, 0, 0, 0)),
        scratch_shapes=[
            pltpu.VMEM((Ho + 2, Wo + 2, Ep), jnp.float32),
            pltpu.VMEM((Ho + 2, Wo + 2, Ep), jnp.float32),
        ],
        compiler_params=pltpu.CompilerParams(
            dimension_semantics=("parallel",),   # batch grid -> 2 TCs on v7x
            vmem_limit_bytes=vmem_limit),
    )(p1, w1, b1, w2, b2, w3, scale, shift)

    out = out[..., :E]                                          # drop lane padding
    return jnp.transpose(out, (0, 3, 1, 2))                     # NHWC -> NCHW


# ---------------------------- deterministic params ---------------------------

def init_params(key, in_dims, embed_dim, eps=1e-5):
    ks = jax.random.split(key, 8)

    def conv_w(k, cin, cout):
        fan_in = 3 * 3 * cin
        return (jax.random.normal(k, (3, 3, cin, cout), jnp.float32)
                / math.sqrt(fan_in))

    w1 = conv_w(ks[0], in_dims, embed_dim)
    w2 = conv_w(ks[1], embed_dim, embed_dim)
    w3 = conv_w(ks[2], embed_dim, embed_dim)
    b1 = 0.01 * jax.random.normal(ks[3], (1, embed_dim), jnp.float32)
    b2 = 0.01 * jax.random.normal(ks[4], (1, embed_dim), jnp.float32)
    b3 = 0.01 * jax.random.normal(ks[5], (1, embed_dim), jnp.float32)

    # BatchNorm2d (eval mode) parameters / running stats.
    gamma = 1.0 + 0.1 * jax.random.normal(ks[6], (1, embed_dim), jnp.float32)
    beta = 0.1 * jax.random.normal(ks[7], (1, embed_dim), jnp.float32)
    running_mean = jnp.zeros((1, embed_dim), jnp.float32)
    running_var = jnp.ones((1, embed_dim), jnp.float32)
    bn_scale = gamma / jnp.sqrt(running_var + eps)
    bn_shift = beta - running_mean * bn_scale

    return dict(w1=w1, b1=b1, w2=w2, b2=b2, w3=w3, b3=b3,
                bn_scale=bn_scale, bn_shift=bn_shift)


# ----------------------------- pure-JAX reference ----------------------------

def _ref_forward(x_nchw, params):
    x = jnp.transpose(x_nchw, (0, 2, 3, 1))
    dn = ("NHWC", "HWIO", "NHWC")

    def conv(x, w, b, stride):
        y = lax.conv_general_dilated(x, w, (stride, stride),
                                     ((1, 1), (1, 1)), dimension_numbers=dn)
        return y + b.reshape(1, 1, 1, -1)

    y = jax.nn.gelu(conv(x, params["w1"], params["b1"], 2), approximate=False)
    y = jax.nn.gelu(conv(y, params["w2"], params["b2"], 1), approximate=False)
    y = conv(y, params["w3"], params["b3"], 1)
    y = y * params["bn_scale"].reshape(1, 1, 1, -1) \
        + params["bn_shift"].reshape(1, 1, 1, -1)
    return jnp.transpose(y, (0, 3, 1, 2))


# ------------------------------------ main ------------------------------------

if __name__ == "__main__":
    key = jax.random.PRNGKey(0)
    k_x, k_p = jax.random.split(key)

    N, Cin, H, W = 2, 4, 16, 16
    embed_dim = 32

    x = jax.random.normal(k_x, (N, Cin, H, W), jnp.float32)
    params = init_params(k_p, Cin, embed_dim)

    fwd = jax.jit(overlapping_patch_embed)
    out = jax.block_until_ready(fwd(x, params))
    assert out.shape == (N, embed_dim, H // 2, W // 2), out.shape

    ref = jax.block_until_ready(_ref_forward(x, params))
    max_err = float(jnp.max(jnp.abs(out - ref)))
    # bf16 MXU operands with f32 accumulation -> allow a few 1e-2 of drift
    # against the all-f32 reference.
    assert jnp.allclose(out, ref, rtol=5e-2, atol=5e-2), max_err
    print("KERNEL_OK")
</pallas_src>

<mosaic_0001>
module attributes {stable_mosaic.version = 11 : i64} {
  func.func @_patch_embed_kernel(%arg0: i32, %arg1: memref<1x64x36xbf16, #tpu.memory_space<vmem>>, %arg2: memref<36x128xbf16, #tpu.memory_space<vmem>>, %arg3: memref<1x128xf32, #tpu.memory_space<vmem>>, %arg4: memref<9x128x128xbf16, #tpu.memory_space<vmem>>, %arg5: memref<1x128xf32, #tpu.memory_space<vmem>>, %arg6: memref<9x128x128xbf16, #tpu.memory_space<vmem>>, %arg7: memref<1x128xf32, #tpu.memory_space<vmem>>, %arg8: memref<1x128xf32, #tpu.memory_space<vmem>>, %arg9: memref<1x8x8x128xf32, #tpu.memory_space<vmem>>, %arg10: memref<10x10x128xf32, #tpu.memory_space<vmem>>, %arg11: memref<10x10x128xf32, #tpu.memory_space<vmem>>) attributes {dimension_semantics = [#tpu.dimension_semantics<parallel>], iteration_bounds = array<i64: 2>, scalar_prefetch = 0 : i64, scratch_operands = 2 : i64, tpu.core_type = #tpu.core_type<tc>, window_params = [{transform_indices = @transform_0, window_bounds = array<i64: 1, 64, 36>}, {pipeline_mode = #tpu.pipeline_mode<synchronous>, transform_indices = @transform_1, window_bounds = array<i64: 36, 128>}, {pipeline_mode = #tpu.pipeline_mode<synchronous>, transform_indices = @transform_2, window_bounds = array<i64: 1, 128>}, {pipeline_mode = #tpu.pipeline_mode<synchronous>, transform_indices = @transform_3, window_bounds = array<i64: 9, 128, 128>}, {pipeline_mode = #tpu.pipeline_mode<synchronous>, transform_indices = @transform_4, window_bounds = array<i64: 1, 128>}, {pipeline_mode = #tpu.pipeline_mode<synchronous>, transform_indices = @transform_5, window_bounds = array<i64: 9, 128, 128>}, {pipeline_mode = #tpu.pipeline_mode<synchronous>, transform_indices = @transform_6, window_bounds = array<i64: 1, 128>}, {pipeline_mode = #tpu.pipeline_mode<synchronous>, transform_indices = @transform_7, window_bounds = array<i64: 1, 128>}, {transform_indices = @transform_8, window_bounds = array<i64: 1, 8, 8, 128>}]} {
    %c0 = arith.constant 0 : index
    %c0_0 = arith.constant 0 : index
    %c0_1 = arith.constant 0 : index
    %0 = vector.load %arg1[%c0, %c0_0, %c0_1] : memref<1x64x36xbf16, #tpu.memory_space<vmem>>, vector<1x64x36xbf16>
    %1 = vector.shape_cast %0 : vector<1x64x36xbf16> to vector<64x36xbf16>
    %c0_2 = arith.constant 0 : index
    %c0_3 = arith.constant 0 : index
    %2 = vector.load %arg2[%c0_2, %c0_3] : memref<36x128xbf16, #tpu.memory_space<vmem>>, vector<36x128xbf16>
    %cst = arith.constant dense<0.000000e+00> : vector<64x128xf32>
    %3 = tpu.matmul %1, %2, %cst {dimension_numbers = #tpu.dot_dimension_numbers<[1], [0], [0], [1], [0, 0, 1, 1], [], []>} : vector<64x36xbf16>, vector<36x128xbf16>, vector<64x128xf32> -> vector<64x128xf32>
    %c0_4 = arith.constant 0 : index
    %c0_5 = arith.constant 0 : index
    %4 = vector.load %arg3[%c0_4, %c0_5] : memref<1x128xf32, #tpu.memory_space<vmem>>, vector<1x128xf32>
    %5 = vector.broadcast %4 : vector<1x128xf32> to vector<64x128xf32>
    %6 = arith.addf %3, %5 : vector<64x128xf32>
    %cst_6 = arith.constant 5.000000e-01 : f32
    %7 = vector.broadcast %cst_6 : f32 to vector<64x128xf32>
    %8 = arith.mulf %7, %6 : vector<64x128xf32>
    %cst_7 = arith.constant 0.707106769 : f32
    %9 = vector.broadcast %cst_7 : f32 to vector<64x128xf32>
    %10 = arith.mulf %6, %9 : vector<64x128xf32>
    %11 = math.erf %10 : vector<64x128xf32>
    %cst_8 = arith.constant 1.000000e+00 : f32
    %12 = vector.broadcast %cst_8 : f32 to vector<64x128xf32>
    %13 = arith.addf %12, %11 : vector<64x128xf32>
    %14 = arith.mulf %8, %13 : vector<64x128xf32>
    %cst_9 = arith.constant 0.000000e+00 : f32
    %15 = vector.broadcast %cst_9 : f32 to vector<10x10x128xf32>
    %c0_10 = arith.constant 0 : index
    %c0_11 = arith.constant 0 : index
    %c0_12 = arith.constant 0 : index
    %16 = vector.load %arg10[%c0_10, %c0_11, %c0_12] : memref<10x10x128xf32, #tpu.memory_space<vmem>>, vector<10x10x128xf32>
    tpu.vector_store %arg10[%c0_10, %c0_11, %c0_12], %15 {strides = array<i32>} : memref<10x10x128xf32, #tpu.memory_space<vmem>>, vector<10x10x128xf32>,
    %17 = vector.shape_cast %14 : vector<64x128xf32> to vector<8x8x128xf32>
    %c1 = arith.constant 1 : index
    %c1_13 = arith.constant 1 : index
    %c0_14 = arith.constant 0 : index
    %18 = vector.load %arg10[%c1, %c1_13, %c0_14] : memref<10x10x128xf32, #tpu.memory_space<vmem>>, vector<8x8x128xf32>
    tpu.vector_store %arg10[%c1, %c1_13, %c0_14], %17 {strides = array<i32>} : memref<10x10x128xf32, #tpu.memory_space<vmem>>, vector<8x8x128xf32>,
    %cst_15 = arith.constant 0.000000e+00 : f32
    %19 = vector.broadcast %cst_15 : f32 to vector<64x128xf32>
    %c0_16 = arith.constant 0 : index
    %c0_17 = arith.constant 0 : index
    %c0_18 = arith.constant 0 : index
    %20 = vector.load %arg10[%c0_16, %c0_17, %c0_18] : memref<10x10x128xf32, #tpu.memory_space<vmem>>, vector<8x8x128xf32>
    %21 = vector.shape_cast %20 : vector<8x8x128xf32> to vector<64x128xf32>
    %22 = arith.truncf %21 : vector<64x128xf32> to vector<64x128xbf16>
    %c0_19 = arith.constant 0 : index
    %c0_20 = arith.constant 0 : index
    %c0_21 = arith.constant 0 : index
    %23 = vector.load %arg4[%c0_19, %c0_20, %c0_21] : memref<9x128x128xbf16, #tpu.memory_space<vmem>>, vector<1x128x128xbf16>
    %24 = vector.shape_cast %23 : vector<1x128x128xbf16> to vector<128x128xbf16>
    %cst_22 = arith.constant dense<0.000000e+00> : vector<64x128xf32>
    %25 = tpu.matmul %22, %24, %cst_22 {dimension_numbers = #tpu.dot_dimension_numbers<[1], [0], [0], [1], [0, 0, 1, 1], [], []>} : vector<64x128xbf16>, vector<128x128xbf16>, vector<64x128xf32> -> vector<64x128xf32>
    %26 = arith.addf %19, %25 : vector<64x128xf32>
    %c0_23 = arith.constant 0 : index
    %c1_24 = arith.constant 1 : index
    %c0_25 = arith.constant 0 : index
    %27 = vector.load %arg10[%c0_23, %c1_24, %c0_25] : memref<10x10x128xf32, #tpu.memory_space<vmem>>, vector<8x8x128xf32>
    %28 = vector.shape_cast %27 : vector<8x8x128xf32> to vector<64x128xf32>
    %29 = arith.truncf %28 : vector<64x128xf32> to vector<64x128xbf16>
    %c1_26 = arith.constant 1 : index
    %c0_27 = arith.constant 0 : index
    %c0_28 = arith.constant 0 : index
    %30 = vector.load %arg4[%c1_26, %c0_27, %c0_28] : memref<9x128x128xbf16, #tpu.memory_space<vmem>>, vector<1x128x128xbf16>
    %31 = vector.shape_cast %30 : vector<1x128x128xbf16> to vector<128x128xbf16>
    %cst_29 = arith.constant dense<0.000000e+00> : vector<64x128xf32>
    %32 = tpu.matmul %29, %31, %cst_29 {dimension_numbers = #tpu.dot_dimension_numbers<[1], [0], [0], [1], [0, 0, 1, 1], [], []>} : vector<64x128xbf16>, vector<128x128xbf16>, vector<64x128xf32> -> vector<64x128xf32>
    %33 = arith.addf %26, %32 : vector<64x128xf32>
    %c0_30 = arith.constant 0 : index
    %c2 = arith.constant 2 : index
    %c0_31 = arith.constant 0 : index
    %34 = vector.load %arg10[%c0_30, %c2, %c0_31] : memref<10x10x128xf32, #tpu.memory_space<vmem>>, vector<8x8x128xf32>
    %35 = vector.shape_cast %34 : vector<8x8x128xf32> to vector<64x128xf32>
    %36 = arith.truncf %35 : vector<64x128xf32> to vector<64x128xbf16>
    %c2_32 = arith.constant 2 : index
    %c0_33 = arith.constant 0 : index
    %c0_34 = arith.constant 0 : index
    %37 = vector.load %arg4[%c2_32, %c0_33, %c0_34] : memref<9x128x128xbf16, #tpu.memory_space<vmem>>, vector<1x128x128xbf16>
    %38 = vector.shape_cast %37 : vector<1x128x128xbf16> to vector<128x128xbf16>
    %cst_35 = arith.constant dense<0.000000e+00> : vector<64x128xf32>
    %39 = tpu.matmul %36, %38, %cst_35 {dimension_numbers = #tpu.dot_dimension_numbers<[1], [0], [0], [1], [0, 0, 1, 1], [], []>} : vector<64x128xbf16>, vector<128x128xbf16>, vector<64x128xf32> -> vector<64x128xf32>
    %40 = arith.addf %33, %39 : vector<64x128xf32>
    %c1_36 = arith.constant 1 : index
    %c0_37 = arith.constant 0 : index
    %c0_38 = arith.constant 0 : index
    %41 = vector.load %arg10[%c1_36, %c0_37, %c0_38] : memref<10x10x128xf32, #tpu.memory_space<vmem>>, vector<8x8x128xf32>
    %42 = vector.shape_cast %41 : vector<8x8x128xf32> to vector<64x128xf32>
    %43 = arith.truncf %42 : vector<64x128xf32> to vector<64x128xbf16>
    %c3 = arith.constant 3 : index
    %c0_39 = arith.constant 0 : index
    %c0_40 = arith.constant 0 : index
    %44 = vector.load %arg4[%c3, %c0_39, %c0_40] : memref<9x128x128xbf16, #tpu.memory_space<vmem>>, vector<1x128x128xbf16>
    %45 = vector.shape_cast %44 : vector<1x128x128xbf16> to vector<128x128xbf16>
    %cst_41 = arith.constant dense<0.000000e+00> : vector<64x128xf32>
    %46 = tpu.matmul %43, %45, %cst_41 {dimension_numbers = #tpu.dot_dimension_numbers<[1], [0], [0], [1], [0, 0, 1, 1], [], []>} : vector<64x128xbf16>, vector<128x128xbf16>, vector<64x128xf32> -> vector<64x128xf32>
    %47 = arith.addf %40, %46 : vector<64x128xf32>
    %c1_42 = arith.constant 1 : index
    %c1_43 = arith.constant 1 : index
    %c0_44 = arith.constant 0 : index
    %48 = vector.load %arg10[%c1_42, %c1_43, %c0_44] : memref<10x10x128xf32, #tpu.memory_space<vmem>>, vector<8x8x128xf32>
    %49 = vector.shape_cast %48 : vector<8x8x128xf32> to vector<64x128xf32>
    %50 = arith.truncf %49 : vector<64x128xf32> to vector<64x128xbf16>
    %c4 = arith.constant 4 : index
    %c0_45 = arith.constant 0 : index
    %c0_46 = arith.constant 0 : index
    %51 = vector.load %arg4[%c4, %c0_45, %c0_46] : memref<9x128x128xbf16, #tpu.memory_space<vmem>>, vector<1x128x128xbf16>
    %52 = vector.shape_cast %51 : vector<1x128x128xbf16> to vector<128x128xbf16>
    %cst_47 = arith.constant dense<0.000000e+00> : vector<64x128xf32>
    %53 = tpu.matmul %50, %52, %cst_47 {dimension_numbers = #tpu.dot_dimension_numbers<[1], [0], [0], [1], [0, 0, 1, 1], [], []>} : vector<64x128xbf16>, vector<128x128xbf16>, vector<64x128xf32> -> vector<64x128xf32>
    %54 = arith.addf %47, %53 : vector<64x128xf32>
    %c1_48 = arith.constant 1 : index
    %c2_49 = arith.constant 2 : index
    %c0_50 = arith.constant 0 : index
    %55 = vector.load %arg10[%c1_48, %c2_49, %c0_50] : memref<10x10x128xf32, #tpu.memory_space<vmem>>, vector<8x8x128xf32>
    %56 = vector.shape_cast %55 : vector<8x8x128xf32> to vector<64x128xf32>
    %57 = arith.truncf %56 : vector<64x128xf32> to vector<64x128xbf16>
    %c5 = arith.constant 5 : index
    %c0_51 = arith.constant 0 : index
    %c0_52 = arith.constant 0 : index
    %58 = vector.load %arg4[%c5, %c0_51, %c0_52] : memref<9x128x128xbf16, #tpu.memory_space<vmem>>, vector<1x128x128xbf16>
    %59 = vector.shape_cast %58 : vector<1x128x128xbf16> to vector<128x128xbf16>
    %cst_53 = arith.constant dense<0.000000e+00> : vector<64x128xf32>
    %60 = tpu.matmul %57, %59, %cst_53 {dimension_numbers = #tpu.dot_dimension_numbers<[1], [0], [0], [1], [0, 0, 1, 1], [], []>} : vector<64x128xbf16>, vector<128x128xbf16>, vector<64x128xf32> -> vector<64x128xf32>
    %61 = arith.addf %54, %60 : vector<64x128xf32>
    %c2_54 = arith.constant 2 : index
    %c0_55 = arith.constant 0 : index
    %c0_56 = arith.constant 0 : index
    %62 = vector.load %arg10[%c2_54, %c0_55, %c0_56] : memref<10x10x128xf32, #tpu.memory_space<vmem>>, vector<8x8x128xf32>
    %63 = vector.shape_cast %62 : vector<8x8x128xf32> to vector<64x128xf32>
    %64 = arith.truncf %63 : vector<64x128xf32> to vector<64x128xbf16>
    %c6 = arith.constant 6 : index
    %c0_57 = arith.constant 0 : index
    %c0_58 = arith.constant 0 : index
    %65 = vector.load %arg4[%c6, %c0_57, %c0_58] : memref<9x128x128xbf16, #tpu.memory_space<vmem>>, vector<1x128x128xbf16>
    %66 = vector.shape_cast %65 : vector<1x128x128xbf16> to vector<128x128xbf16>
    %cst_59 = arith.constant dense<0.000000e+00> : vector<64x128xf32>
    %67 = tpu.matmul %64, %66, %cst_59 {dimension_numbers = #tpu.dot_dimension_numbers<[1], [0], [0], [1], [0, 0, 1, 1], [], []>} : vector<64x128xbf16>, vector<128x128xbf16>, vector<64x128xf32> -> vector<64x128xf32>
    %68 = arith.addf %61, %67 : vector<64x128xf32>
    %c2_60 = arith.constant 2 : index
    %c1_61 = arith.constant 1 : index
    %c0_62 = arith.constant 0 : index
    %69 = vector.load %arg10[%c2_60, %c1_61, %c0_62] : memref<10x10x128xf32, #tpu.memory_space<vmem>>, vector<8x8x128xf32>
    %70 = vector.shape_cast %69 : vector<8x8x128xf32> to vector<64x128xf32>
    %71 = arith.truncf %70 : vector<64x128xf32> to vector<64x128xbf16>
    %c7 = arith.constant 7 : index
    %c0_63 = arith.constant 0 : index
    %c0_64 = arith.constant 0 : index
    %72 = vector.load %arg4[%c7, %c0_63, %c0_64] : memref<9x128x128xbf16, #tpu.memory_space<vmem>>, vector<1x128x128xbf16>
    %73 = vector.shape_cast %72 : vector<1x128x128xbf16> to vector<128x128xbf16>
    %cst_65 = arith.constant dense<0.000000e+00> : vector<64x128xf32>
    %74 = tpu.matmul %71, %73, %cst_65 {dimension_numbers = #tpu.dot_dimension_numbers<[1], [0], [0], [1], [0, 0, 1, 1], [], []>} : vector<64x128xbf16>, vector<128x128xbf16>, vector<64x128xf32> -> vector<64x128xf32>
    %75 = arith.addf %68, %74 : vector<64x128xf32>
    %c2_66 = arith.constant 2 : index
    %c2_67 = arith.constant 2 : index
    %c0_68 = arith.constant 0 : index
    %76 = vector.load %arg10[%c2_66, %c2_67, %c0_68] : memref<10x10x128xf32, #tpu.memory_space<vmem>>, vector<8x8x128xf32>
    %77 = vector.shape_cast %76 : vector<8x8x128xf32> to vector<64x128xf32>
    %78 = arith.truncf %77 : vector<64x128xf32> to vector<64x128xbf16>
    %c8 = arith.constant 8 : index
    %c0_69 = arith.constant 0 : index
    %c0_70 = arith.constant 0 : index
    %79 = vector.load %arg4[%c8, %c0_69, %c0_70] : memref<9x128x128xbf16, #tpu.memory_space<vmem>>, vector<1x128x128xbf16>
    %80 = vector.shape_cast %79 : vector<1x128x128xbf16> to vector<128x128xbf16>
    %cst_71 = arith.constant dense<0.000000e+00> : vector<64x128xf32>
    %81 = tpu.matmul %78, %80, %cst_71 {dimension_numbers = #tpu.dot_dimension_numbers<[1], [0], [0], [1], [0, 0, 1, 1], [], []>} : vector<64x128xbf16>, vector<128x128xbf16>, vector<64x128xf32> -> vector<64x128xf32>
    %82 = arith.addf %75, %81 : vector<64x128xf32>
    %c0_72 = arith.constant 0 : index
    %c0_73 = arith.constant 0 : index
    %83 = vector.load %arg5[%c0_72, %c0_73] : memref<1x128xf32, #tpu.memory_space<vmem>>, vector<1x128xf32>
    %84 = vector.broadcast %83 : vector<1x128xf32> to vector<64x128xf32>
    %85 = arith.addf %82, %84 : vector<64x128xf32>
    %cst_74 = arith.constant 5.000000e-01 : f32
    %86 = vector.broadcast %cst_74 : f32 to vector<64x128xf32>
    %87 = arith.mulf %86, %85 : vector<64x128xf32>
    %cst_75 = arith.constant 0.707106769 : f32
    %88 = vector.broadcast %cst_75 : f32 to vector<64x128xf32>
    %89 = arith.mulf %85, %88 : vector<64x128xf32>
    %90 = math.erf %89 : vector<64x128xf32>
    %cst_76 = arith.constant 1.000000e+00 : f32
    %91 = vector.broadcast %cst_76 : f32 to vector<64x128xf32>
    %92 = arith.addf %91, %90 : vector<64x128xf32>
    %93 = arith.mulf %87, %92 : vector<64x128xf32>
    %cst_77 = arith.constant 0.000000e+00 : f32
    %94 = vector.broadcast %cst_77 : f32 to vector<10x10x128xf32>
    %c0_78 = arith.constant 0 : index
    %c0_79 = arith.constant 0 : index
    %c0_80 = arith.constant 0 : index
    %95 = vector.load %arg11[%c0_78, %c0_79, %c0_80] : memref<10x10x128xf32, #tpu.memory_space<vmem>>, vector<10x10x128xf32>
    tpu.vector_store %arg11[%c0_78, %c0_79, %c0_80], %94 {strides = array<i32>} : memref<10x10x128xf32, #tpu.memory_space<vmem>>, vector<10x10x128xf32>,
    %96 = vector.shape_cast %93 : vector<64x128xf32> to vector<8x8x128xf32>
    %c1_81 = arith.constant 1 : index
    %c1_82 = arith.constant 1 : index
    %c0_83 = arith.constant 0 : index
    %97 = vector.load %arg11[%c1_81, %c1_82, %c0_83] : memref<10x10x128xf32, #tpu.memory_space<vmem>>, vector<8x8x128xf32>
    tpu.vector_store %arg11[%c1_81, %c1_82, %c0_83], %96 {strides = array<i32>} : memref<10x10x128xf32, #tpu.memory_space<vmem>>, vector<8x8x128xf32>,
    %cst_84 = arith.constant 0.000000e+00 : f32
    %98 = vector.broadcast %cst_84 : f32 to vector<64x128xf32>
    %c0_85 = arith.constant 0 : index
    %c0_86 = arith.constant 0 : index
    %c0_87 = arith.constant 0 : index
    %99 = vector.load %arg11[%c0_85, %c0_86, %c0_87] : memref<10x10x128xf32, #tpu.memory_space<vmem>>, vector<8x8x128xf32>
    %100 = vector.shape_cast %99 : vector<8x8x128xf32> to vector<64x128xf32>
    %101 = arith.truncf %100 : vector<64x128xf32> to vector<64x128xbf16>
    %c0_88 = arith.constant 0 : index
    %c0_89 = arith.constant 0 : index
    %c0_90 = arith.constant 0 : index
    %102 = vector.load %arg6[%c0_88, %c0_89, %c0_90] : memref<9x128x128xbf16, #tpu.memory_space<vmem>>, vector<1x128x128xbf16>
    %103 = vector.shape_cast %102 : vector<1x128x128xbf16> to vector<128x128xbf16>
    %cst_91 = arith.constant dense<0.000000e+00> : vector<64x128xf32>
    %104 = tpu.matmul %101, %103, %cst_91 {dimension_numbers = #tpu.dot_dimension_numbers<[1], [0], [0], [1], [0, 0, 1, 1], [], []>} : vector<64x128xbf16>, vector<128x128xbf16>, vector<64x128xf32> -> vector<64x128xf32>
    %105 = arith.addf %98, %104 : vector<64x128xf32>
    %c0_92 = arith.constant 0 : index
    %c1_93 = arith.constant 1 : index
    %c0_94 = arith.constant 0 : index
    %106 = vector.load %arg11[%c0_92, %c1_93, %c0_94] : memref<10x10x128xf32, #tpu.memory_space<vmem>>, vector<8x8x128xf32>
    %107 = vector.shape_cast %106 : vector<8x8x128xf32> to vector<64x128xf32>
    %108 = arith.truncf %107 : vector<64x128xf32> to vector<64x128xbf16>
    %c1_95 = arith.constant 1 : index
    %c0_96 = arith.constant 0 : index
    %c0_97 = arith.constant 0 : index
    %109 = vector.load %arg6[%c1_95, %c0_96, %c0_97] : memref<9x128x128xbf16, #tpu.memory_space<vmem>>, vector<1x128x128xbf16>
    %110 = vector.shape_cast %109 : vector<1x128x128xbf16> to vector<128x128xbf16>
    %cst_98 = arith.constant dense<0.000000e+00> : vector<64x128xf32>
    %111 = tpu.matmul %108, %110, %cst_98 {dimension_numbers = #tpu.dot_dimension_numbers<[1], [0], [0], [1], [0, 0, 1, 1], [], []>} : vector<64x128xbf16>, vector<128x128xbf16>, vector<64x128xf32> -> vector<64x128xf32>
    %112 = arith.addf %105, %111 : vector<64x128xf32>
    %c0_99 = arith.constant 0 : index
    %c2_100 = arith.constant 2 : index
    %c0_101 = arith.constant 0 : index
    %113 = vector.load %arg11[%c0_99, %c2_100, %c0_101] : memref<10x10x128xf32, #tpu.memory_space<vmem>>, vector<8x8x128xf32>
    %114 = vector.shape_cast %113 : vector<8x8x128xf32> to vector<64x128xf32>
    %115 = arith.truncf %114 : vector<64x128xf32> to vector<64x128xbf16>
    %c2_102 = arith.constant 2 : index
    %c0_103 = arith.constant 0 : index
    %c0_104 = arith.constant 0 : index
    %116 = vector.load %arg6[%c2_102, %c0_103, %c0_104] : memref<9x128x128xbf16, #tpu.memory_space<vmem>>, vector<1x128x128xbf16>
    %117 = vector.shape_cast %116 : vector<1x128x128xbf16> to vector<128x128xbf16>
    %cst_105 = arith.constant dense<0.000000e+00> : vector<64x128xf32>
    %118 = tpu.matmul %115, %117, %cst_105 {dimension_numbers = #tpu.dot_dimension_numbers<[1], [0], [0], [1], [0, 0, 1, 1], [], []>} : vector<64x128xbf16>, vector<128x128xbf16>, vector<64x128xf32> -> vector<64x128xf32>
    %119 = arith.addf %112, %118 : vector<64x128xf32>
    %c1_106 = arith.constant 1 : index
    %c0_107 = arith.constant 0 : index
    %c0_108 = arith.constant 0 : index
    %120 = vector.load %arg11[%c1_106, %c0_107, %c0_108] : memref<10x10x128xf32, #tpu.memory_space<vmem>>, vector<8x8x128xf32>
    %121 = vector.shape_cast %120 : vector<8x8x128xf32> to vector<64x128xf32>
    %122 = arith.truncf %121 : vector<64x128xf32> to vector<64x128xbf16>
    %c3_109 = arith.constant 3 : index
    %c0_110 = arith.constant 0 : index
    %c0_111 = arith.constant 0 : index
    %123 = vector.load %arg6[%c3_109, %c0_110, %c0_111] : memref<9x128x128xbf16, #tpu.memory_space<vmem>>, vector<1x128x128xbf16>
    %124 = vector.shape_cast %123 : vector<1x128x128xbf16> to vector<128x128xbf16>
    %cst_112 = arith.constant dense<0.000000e+00> : vector<64x128xf32>
    %125 = tpu.matmul %122, %124, %cst_112 {dimension_numbers = #tpu.dot_dimension_numbers<[1], [0], [0], [1], [0, 0, 1, 1], [], []>} : vector<64x128xbf16>, vector<128x128xbf16>, vector<64x128xf32> -> vector<64x128xf32>
    %126 = arith.addf %119, %125 : vector<64x128xf32>
    %c1_113 = arith.constant 1 : index
    %c1_114 = arith.constant 1 : index
    %c0_115 = arith.constant 0 : index
    %127 = vector.load %arg11[%c1_113, %c1_114, %c0_115] : memref<10x10x128xf32, #tpu.memory_space<vmem>>, vector<8x8x128xf32>
    %128 = vector.shape_cast %127 : vector<8x8x128xf32> to vector<64x128xf32>
    %129 = arith.truncf %128 : vector<64x128xf32> to vector<64x128xbf16>
    %c4_116 = arith.constant 4 : index
    %c0_117 = arith.constant 0 : index
    %c0_118 = arith.constant 0 : index
    %130 = vector.load %arg6[%c4_116, %c0_117, %c0_118] : memref<9x128x128xbf16, #tpu.memory_space<vmem>>, vector<1x128x128xbf16>
    %131 = vector.shape_cast %130 : vector<1x128x128xbf16> to vector<128x128xbf16>
    %cst_119 = arith.constant dense<0.000000e+00> : vector<64x128xf32>
    %132 = tpu.matmul %129, %131, %cst_119 {dimension_numbers = #tpu.dot_dimension_numbers<[1], [0], [0], [1], [0, 0, 1, 1], [], []>} : vector<64x128xbf16>, vector<128x128xbf16>, vector<64x128xf32> -> vector<64x128xf32>
    %133 = arith.addf %126, %132 : vector<64x128xf32>
    %c1_120 = arith.constant 1 : index
    %c2_121 = arith.constant 2 : index
    %c0_122 = arith.constant 0 : index
    %134 = vector.load %arg11[%c1_120, %c2_121, %c0_122] : memref<10x10x128xf32, #tpu.memory_space<vmem>>, vector<8x8x128xf32>
    %135 = vector.shape_cast %134 : vector<8x8x128xf32> to vector<64x128xf32>
    %136 = arith.truncf %135 : vector<64x128xf32> to vector<64x128xbf16>
    %c5_123 = arith.constant 5 : index
    %c0_124 = arith.constant 0 : index
    %c0_125 = arith.constant 0 : index
    %137 = vector.load %arg6[%c5_123, %c0_124, %c0_125] : memref<9x128x128xbf16, #tpu.memory_space<vmem>>, vector<1x128x128xbf16>
    %138 = vector.shape_cast %137 : vector<1x128x128xbf16> to vector<128x128xbf16>
    %cst_126 = arith.constant dense<0.000000e+00> : vector<64x128xf32>
    %139 = tpu.matmul %136, %138, %cst_126 {dimension_numbers = #tpu.dot_dimension_numbers<[1], [0], [0], [1], [0, 0, 1, 1], [], []>} : vector<64x128xbf16>, vector<128x128xbf16>, vector<64x128xf32> -> vector<64x128xf32>
    %140 = arith.addf %133, %139 : vector<64x128xf32>
    %c2_127 = arith.constant 2 : index
    %c0_128 = arith.constant 0 : index
    %c0_129 = arith.constant 0 : index
    %141 = vector.load %arg11[%c2_127, %c0_128, %c0_129] : memref<10x10x128xf32, #tpu.memory_space<vmem>>, vector<8x8x128xf32>
    %142 = vector.shape_cast %141 : vector<8x8x128xf32> to vector<64x128xf32>
    %143 = arith.truncf %142 : vector<64x128xf32> to vector<64x128xbf16>
    %c6_130 = arith.constant 6 : index
    %c0_131 = arith.constant 0 : index
    %c0_132 = arith.constant 0 : index
    %144 = vector.load %arg6[%c6_130, %c0_131, %c0_132] : memref<9x128x128xbf16, #tpu.memory_space<vmem>>, vector<1x128x128xbf16>
    %145 = vector.shape_cast %144 : vector<1x128x128xbf16> to vector<128x128xbf16>
    %cst_133 = arith.constant dense<0.000000e+00> : vector<64x128xf32>
    %146 = tpu.matmul %143, %145, %cst_133 {dimension_numbers = #tpu.dot_dimension_numbers<[1], [0], [0], [1], [0, 0, 1, 1], [], []>} : vector<64x128xbf16>, vector<128x128xbf16>, vector<64x128xf32> -> vector<64x128xf32>
    %147 = arith.addf %140, %146 : vector<64x128xf32>
    %c2_134 = arith.constant 2 : index
    %c1_135 = arith.constant 1 : index
    %c0_136 = arith.constant 0 : index
    %148 = vector.load %arg11[%c2_134, %c1_135, %c0_136] : memref<10x10x128xf32, #tpu.memory_space<vmem>>, vector<8x8x128xf32>
    %149 = vector.shape_cast %148 : vector<8x8x128xf32> to vector<64x128xf32>
    %150 = arith.truncf %149 : vector<64x128xf32> to vector<64x128xbf16>
    %c7_137 = arith.constant 7 : index
    %c0_138 = arith.constant 0 : index
    %c0_139 = arith.constant 0 : index
    %151 = vector.load %arg6[%c7_137, %c0_138, %c0_139] : memref<9x128x128xbf16, #tpu.memory_space<vmem>>, vector<1x128x128xbf16>
    %152 = vector.shape_cast %151 : vector<1x128x128xbf16> to vector<128x128xbf16>
    %cst_140 = arith.constant dense<0.000000e+00> : vector<64x128xf32>
    %153 = tpu.matmul %150, %152, %cst_140 {dimension_numbers = #tpu.dot_dimension_numbers<[1], [0], [0], [1], [0, 0, 1, 1], [], []>} : vector<64x128xbf16>, vector<128x128xbf16>, vector<64x128xf32> -> vector<64x128xf32>
    %154 = arith.addf %147, %153 : vector<64x128xf32>
    %c2_141 = arith.constant 2 : index
    %c2_142 = arith.constant 2 : index
    %c0_143 = arith.constant 0 : index
    %155 = vector.load %arg11[%c2_141, %c2_142, %c0_143] : memref<10x10x128xf32, #tpu.memory_space<vmem>>, vector<8x8x128xf32>
    %156 = vector.shape_cast %155 : vector<8x8x128xf32> to vector<64x128xf32>
    %157 = arith.truncf %156 : vector<64x128xf32> to vector<64x128xbf16>
    %c8_144 = arith.constant 8 : index
    %c0_145 = arith.constant 0 : index
    %c0_146 = arith.constant 0 : index
    %158 = vector.load %arg6[%c8_144, %c0_145, %c0_146] : memref<9x128x128xbf16, #tpu.memory_space<vmem>>, vector<1x128x128xbf16>
    %159 = vector.shape_cast %158 : vector<1x128x128xbf16> to vector<128x128xbf16>
    %cst_147 = arith.constant dense<0.000000e+00> : vector<64x128xf32>
    %160 = tpu.matmul %157, %159, %cst_147 {dimension_numbers = #tpu.dot_dimension_numbers<[1], [0], [0], [1], [0, 0, 1, 1], [], []>} : vector<64x128xbf16>, vector<128x128xbf16>, vector<64x128xf32> -> vector<64x128xf32>
    %161 = arith.addf %154, %160 : vector<64x128xf32>
    %c0_148 = arith.constant 0 : index
    %c0_149 = arith.constant 0 : index
    %162 = vector.load %arg7[%c0_148, %c0_149] : memref<1x128xf32, #tpu.memory_space<vmem>>, vector<1x128xf32>
    %163 = vector.broadcast %162 : vector<1x128xf32> to vector<64x128xf32>
    %164 = arith.mulf %161, %163 : vector<64x128xf32>
    %c0_150 = arith.constant 0 : index
    %c0_151 = arith.constant 0 : index
    %165 = vector.load %arg8[%c0_150, %c0_151] : memref<1x128xf32, #tpu.memory_space<vmem>>, vector<1x128xf32>
    %166 = vector.broadcast %165 : vector<1x128xf32> to vector<64x128xf32>
    %167 = arith.addf %164, %166 : vector<64x128xf32>
    %168 = vector.shape_cast %167 : vector<64x128xf32> to vector<8x8x128xf32>
    %c0_152 = arith.constant 0 : index
    %c0_153 = arith.constant 0 : index
    %c0_154 = arith.constant 0 : index
    %c0_155 = arith.constant 0 : index
    %169 = vector.load %arg9[%c0_152, %c0_153, %c0_154, %c0_155] : memref<1x8x8x128xf32, #tpu.memory_space<vmem>>, vector<1x8x8x128xf32>
    %170 = vector.shape_cast %169 : vector<1x8x8x128xf32> to vector<8x8x128xf32>
    %171 = vector.shape_cast %168 : vector<8x8x128xf32> to vector<1x8x8x128xf32>
    tpu.vector_store %arg9[%c0_152, %c0_153, %c0_154, %c0_155], %171 {strides = array<i32>} : memref<1x8x8x128xf32, #tpu.memory_space<vmem>>, vector<1x8x8x128xf32>,
    return
  }
  func.func @transform_0(%arg0: i32) -> (i32, i32, i32) {
    %c0_i32 = arith.constant 0 : i32
    %c0_i32_0 = arith.constant 0 : i32
    %c0_i32_1 = arith.constant 0 : i32
    return %arg0, %c0_i32, %c0_i32_0 : i32, i32, i32
  }
  func.func @transform_1(%arg0: i32) -> (i32, i32) {
    %c0_i32 = arith.constant 0 : i32
    %c0_i32_0 = arith.constant 0 : i32
    %c0_i32_1 = arith.constant 0 : i32
    return %c0_i32, %c0_i32_0 : i32, i32
  }
  func.func @transform_2(%arg0: i32) -> (i32, i32) {
    %c0_i32 = arith.constant 0 : i32
    %c0_i32_0 = arith.constant 0 : i32
    %c0_i32_1 = arith.constant 0 : i32
    return %c0_i32, %c0_i32_0 : i32, i32
  }
  func.func @transform_3(%arg0: i32) -> (i32, i32, i32) {
    %c0_i32 = arith.constant 0 : i32
    %c0_i32_0 = arith.constant 0 : i32
    %c0_i32_1 = arith.constant 0 : i32
    %c0_i32_2 = arith.constant 0 : i32
    return %c0_i32, %c0_i32_0, %c0_i32_1 : i32, i32, i32
  }
  func.func @transform_4(%arg0: i32) -> (i32, i32) {
    %c0_i32 = arith.constant 0 : i32
    %c0_i32_0 = arith.constant 0 : i32
    %c0_i32_1 = arith.constant 0 : i32
    return %c0_i32, %c0_i32_0 : i32, i32
  }
  func.func @transform_5(%arg0: i32) -> (i32, i32, i32) {
    %c0_i32 = arith.constant 0 : i32
    %c0_i32_0 = arith.constant 0 : i32
    %c0_i32_1 = arith.constant 0 : i32
    %c0_i32_2 = arith.constant 0 : i32
    return %c0_i32, %c0_i32_0, %c0_i32_1 : i32, i32, i32
  }
  func.func @transform_6(%arg0: i32) -> (i32, i32) {
    %c0_i32 = arith.constant 0 : i32
    %c0_i32_0 = arith.constant 0 : i32
    %c0_i32_1 = arith.constant 0 : i32
    return %c0_i32, %c0_i32_0 : i32, i32
  }
  func.func @transform_7(%arg0: i32) -> (i32, i32) {
    %c0_i32 = arith.constant 0 : i32
    %c0_i32_0 = arith.constant 0 : i32
    %c0_i32_1 = arith.constant 0 : i32
    return %c0_i32, %c0_i32_0 : i32, i32
  }
  func.func @transform_8(%arg0: i32) -> (i32, i32, i32, i32) {
    %c0_i32 = arith.constant 0 : i32
    %c0_i32_0 = arith.constant 0 : i32
    %c0_i32_1 = arith.constant 0 : i32
    %c0_i32_2 = arith.constant 0 : i32
    return %arg0, %c0_i32, %c0_i32_0, %c0_i32_1 : i32, i32, i32, i32
  }
}

</mosaic_0001>

<bundles_post_ra>
// kernel: overlapping_patch_embed.1
= control target key start
LH: loop header
LB: loop body
LE: loop exit
PB: predicated region body
PF: predicated region fallthrough
CT: control target
= control target key end

     0   :  { %s4442_s27 = smov 0   ;;  %s5813_s0 = inlined_call_operand.vmem [shape: bf16[2,64,36], index: 0, kind: input, shape index: {}]   ;;  %s5814_s1 = inlined_call_operand.vmem [shape: bf16[36,128], index: 1, kind: input, shape index: {}]   ;;  %s5815_s2 = inlined_call_operand.vmem [shape: f32[1,128], index: 2, kind: input, shape index: {}]   ;;  %s5816_s3 = inlined_call_operand.vmem [shape: bf16[9,128,128], index: 3, kind: input, shape index: {}]   ;;  %s5817_s4 = inlined_call_operand.vmem [shape: f32[1,128], index: 4, kind: input, shape index: {}]   ;;  %s5818_s5 = inlined_call_operand.vmem [shape: bf16[9,128,128], index: 5, kind: input, shape index: {}]   ;;  %s5819_s6 = inlined_call_operand.vmem [shape: f32[1,128], index: 6, kind: input, shape index: {}]   ;;  %s5820_s7 = inlined_call_operand.vmem [shape: f32[1,128], index: 7, kind: input, shape index: {}]   ;;  %s5821_s8 = inlined_call_operand.vmem [shape: f32[2,8,8,128], index: 8, kind: output, shape index: {}]  }
   0x1 LB: > { %s3286_s28 = sadd.s32 4294967295, %s4394_s27   ;;  %p3290_p0 = scmp.ge.s32.totalorder %s4394_s27, 1  ;;  %s4394_s27 = sphi %s4442_s27, %s18_s27  }
   0x2   : > { %p262_p1 = scmp.lt.s32.totalorder %s4394_s27, 3 }
   0x4   : > { %p263_p2 = pnand %p3290_p0, %p262_p1 }
   0x5   : > { %p296_p3 = scmp.lt.s32.totalorder (!%p263_p2), %s3286_s28, 1 }
   0x6   : > { %266 = sbr.rel (%p263_p2) target bundleno = 859 (0x35b), region = 52 }
   0xb   : > { %v319_v0 = vld [vmem:[%s5814_s1 + $0x10] sm:$0x3]  ;;  %vm372_vm0 = vcmask 1041408   ;;  %s5839_s28 = smov (!%p296_p3, %s3286_s28), 1  ;;  %v4180_v4 = vld [vmem:[%s5814_s1 + $0x8] sm:$0xff]  ;;  %v4179_v5 = vld [vmem:[%s5814_s1] sm:$0xff] }
   0xc   : > { %v353_v1 = vunpack.c.l.b16 %v319_v0  ;;  %s4173_s11 = sshll.u32 %s5839_s28, 5  ;;  %vm359_vm1 = vcmask 293888   ;;  %v4468_v10 = vld [vmem:[%s5815_s2] ss:$0 sm:$0xff]  ;;  %v4196_v14 = vld [vmem:[%s5816_s3 + $0x78] sm:$0xff]  ;;  %v4195_v17 = vld [vmem:[%s5816_s3 + $0x70] sm:$0xff] }
   0xd   : > { %s300_s16 = scalar_lea.vmem %s5813_s0, %s4173_s11  ;;  %891 = vmatpush.bf16.msra.mxu1 %v4196_v14  ;;  %4325 = vmatpush.bf16.msra.mxu3 %v4196_v14  ;;  %v4188_v24 = vld [vmem:[%s5816_s3 + $0x38] sm:$0xff]  ;;  %v4194_v29 = vld [vmem:[%s5816_s3 + $0x68] sm:$0xff]  ;;  %v4396_v32 = vmov 0.0   ;;  %v4187_v33 = vld [vmem:[%s5816_s3 + $0x30] sm:$0xff]  ;;  %s4174_s11 = sshll.u32 %s5839_s28, 6 }
   0xe   : > { %v356_v2 = vpack.c.b16 %v353_v1, %v353_v1  ;;  %v4175_v6 = vld [vmem:[%s300_s16] sm:$0xff]  ;;  %v4176_v7 = vld [vmem:[%s300_s16 + $0x8] sm:$0xff]  ;;  %v4177_v8 = vld [vmem:[%s300_s16 + $0x10] sm:$0xff]  ;;  %968 = vmatpush.bf16.msra.mxu2 %v4188_v24  ;;  %759 = vst [vmem:[#allocation2 + $0x10] sm:$0xff] %v4396_v32 }
   0xf   : > { %v4178_v9 = vld [vmem:[%s300_s16 + $0x18] sm:$0xff]  ;;  %760 = vst [vmem:[#allocation2 + $0x18] sm:$0x3] %v4396_v32  ;;  %v4193_v46 = vld [vmem:[%s5816_s3 + $0x60] sm:$0xff]  ;;  %v4186_v49 = vld [vmem:[%s5816_s3 + $0x28] sm:$0xff]  ;;  %s5780_s16 = scalar_lea.vmem %s5821_s8, %s4174_s11 }
  0x10   : > { %v374_v3 = vsel %vm372_vm0, %v356_v2, 0  ;;  %757 = vst [vmem:[#allocation2] sm:$0xff] %v4396_v32  ;;  %v4212_v50 = vld [vmem:[%s5816_s3 + $0xf8] sm:$0xff]  ;;  %v4185_v62 = vld [vmem:[%s5816_s3 + $0x20] sm:$0xff]  ;;  %v4211_v63 = vld [vmem:[%s5816_s3 + $0xf0] sm:$0xff] }
  0x11   : > { %381 = vmatpush.bf16.msra.mxu0 %v374_v3  ;;  %892 = vmatpush.bf16.msra.mxu1 %v4195_v17  ;;  %758 = vst [vmem:[#allocation2 + $0x8] sm:$0x3] %v4396_v32  ;;  %v4192_v59 = vld [vmem:[%s5816_s3 + $0x58] sm:$0xff]  ;;  %v4210_v24 = vld [vmem:[%s5816_s3 + $0xe8] sm:$0xff] }
  0x12   : > { %4326 = vmatpush.bf16.msra.mxu3 %v4195_v17  ;;  %969 = vmatpush.bf16.msra.mxu2 %v4187_v33  ;;  %761 = vst [vmem:[#allocation2 + $0x20] sm:$0xff] %v4396_v32 }
  0x13   : > { %762 = vst [vmem:[#allocation2 + $0x28] sm:$0x3] %v4396_v32 }
  0x14   : > { %763 = vst [vmem:[#allocation2 + $0x30] sm:$0xff] %v4396_v32 }
  0x15   : > { %382 = vmatpush.bf16.msra.mxu0 %v4180_v4  ;;  %893 = vmatpush.bf16.msra.mxu1 %v4194_v29  ;;  %764 = vst [vmem:[#allocation2 + $0x38] sm:$0x3] %v4396_v32 }
  0x16   : > { %4327 = vmatpush.bf16.msra.mxu3 %v4194_v29  ;;  %765 = vst [vmem:[#allocation2 + $0x40] sm:$0xff] %v4396_v32  ;;  %970 = vmatpush.bf16.msra.mxu2 %v4186_v49 }
  0x17   : > { %766 = vst [vmem:[#allocation2 + $0x48] sm:$0x3] %v4396_v32 }
  0x18   : > { %767 = vst [vmem:[#allocation2 + $0x50] sm:$0xff] %v4396_v32 }
  0x19   : > { %383 = vmatpush.bf16.msra.mxu0 %v4179_v5  ;;  %894 = vmatpush.bf16.msra.mxu1 %v4193_v46  ;;  %768 = vst [vmem:[#allocation2 + $0x58] sm:$0x3] %v4396_v32  ;;  %v4191_v5 = vld [vmem:[%s5816_s3 + $0x50] sm:$0xff] }
  0x1a   : > { %4328 = vmatpush.bf16.msra.mxu3 %v4193_v46  ;;  %769 = vst [vmem:[#allocation2 + $0x60] sm:$0xff] %v4396_v32  ;;  %971 = vmatpush.bf16.msra.mxu2 %v4185_v62 }
  0x1b   : > { %770 = vst [vmem:[#allocation2 + $0x68] sm:$0x3] %v4396_v32 }
  0x1c   : > { %3319 = vmatmul.msk.bf16.vlgmr.msra.gmra.mxu0 %vm359_vm1, %v4175_v6  ;;  %771 = vst [vmem:[#allocation2 + $0x70] sm:$0xff] %v4396_v32 }
  0x1d   : > { %1188 = vmatpush.bf16.msrb.mxu0 %v4212_v50  ;;  %895 = vmatpush.bf16.msra.mxu1 %v4192_v59  ;;  %772 = vst [vmem:[#allocation2 + $0x78] sm:$0x3] %v4396_v32 }
  0x1e   : > { %4329 = vmatpush.bf16.msra.mxu3 %v4192_v59  ;;  %773 = vst [vmem:[#allocation2 + $0x80] sm:$0xff] %v4396_v32 }
  0x1f   : > { %774 = vst [vmem:[#allocation2 + $0x88] sm:$0x3] %v4396_v32 }
  0x20   : > { %775 = vst [vmem:[#allocation2 + $0x90] sm:$0xff] %v4396_v32 }
  0x21   : > { %1189 = vmatpush.bf16.msrb.mxu0 %v4211_v63  ;;  %896 = vmatpush.bf16.msra.mxu1 %v4191_v5  ;;  %776 = vst [vmem:[#allocation2 + $0x98] sm:$0x3] %v4396_v32 }
  0x22   : > { %4330 = vmatpush.bf16.msra.mxu3 %v4191_v5  ;;  %2160 = vst [vmem:[#allocation3] sm:$0xff] %v4396_v32 }
  0x23   : > { %2161 = vst [vmem:[#allocation3 + $0x8] sm:$0x3] %v4396_v32 }
  0x24   : > { %2162 = vst [vmem:[#allocation3 + $0x10] sm:$0xff] %v4396_v32 }
  0x25   : > { %1190 = vmatpush.bf16.msrb.mxu0 %v4210_v24  ;;  %2163 = vst [vmem:[#allocation3 + $0x18] sm:$0x3] %v4396_v32 }
  0x26   : > { %2164 = vst [vmem:[#allocation3 + $0x20] sm:$0xff] %v4396_v32 }
  0x27   : > { %2165 = vst [vmem:[#allocation3 + $0x28] sm:$0x3] %v4396_v32 }
  0x28   : > { %2166 = vst [vmem:[#allocation3 + $0x30] sm:$0xff] %v4396_v32 }
  0x29   : > { %2167 = vst [vmem:[#allocation3 + $0x38] sm:$0x3] %v4396_v32 }
  0x2a   : > { %2168 = vst [vmem:[#allocation3 + $0x40] sm:$0xff] %v4396_v32 }
  0x2b   : > { %2169 = vst [vmem:[#allocation3 + $0x48] sm:$0x3] %v4396_v32 }
  0x2c   : > { %3320 = vmatmul.msk.bf16.gmra.mxu0 %vm359_vm1, %v4176_v7  ;;  %2170 = vst [vmem:[#allocation3 + $0x50] sm:$0xff] %v4396_v32 }
  0x2d   : > { %2171 = vst [vmem:[#allocation3 + $0x58] sm:$0x3] %v4396_v32 }
  0x2e   : > { %2172 = vst [vmem:[#allocation3 + $0x60] sm:$0xff] %v4396_v32 }
  0x2f   : > { %2173 = vst [vmem:[#allocation3 + $0x68] sm:$0x3] %v4396_v32 }
  0x30   : > { %2174 = vst [vmem:[#allocation3 + $0x70] sm:$0xff] %v4396_v32 }
  0x31   : > { %2175 = vst [vmem:[#allocation3 + $0x78] sm:$0x3] %v4396_v32 }
  0x32   : > { %2176 = vst [vmem:[#allocation3 + $0x80] sm:$0xff] %v4396_v32 }
  0x33   : > { %2177 = vst [vmem:[#allocation3 + $0x88] sm:$0x3] %v4396_v32 }
  0x34   : > { %2178 = vst [vmem:[#allocation3 + $0x90] sm:$0xff] %v4396_v32 }
  0x35   : > { %2179 = vst [vmem:[#allocation3 + $0x98] sm:$0x3] %v4396_v32 }
  0x3c   : > { %3321 = vmatmul.msk.bf16.gmra.mxu0 %vm359_vm1, %v4177_v8 }
  0x4c   : > { %3322 = vmatmul.msk.bf16.gmra.mxu0 %vm359_vm1, %v4178_v9 }
  0x99   : > { %v385_v11 = vpop.f32.mrf.mxu0 }
  0x9a   : > { %v4471_v12 = vadd.f32 %v4468_v10, %v385_v11 }
  0x9c   : > { %v4474_v13 = vmul.f32 0.70710677, %v4471_v12 }
  0x9e   : > { %v421_v15 = vmul.f32 %v4474_v13, %v4474_v13 }
  0xa0   : > { %v4481_v16 = vmin.f32 %v421_v15, 16.0 }
  0xa1   : > { %v387_v18 = vpop.f32.mrf.mxu0 }
  0xa2   : > { %v423_v19 = vmul.f32 2.1237322e-06, %v4481_v16  ;;  %v434_v20 = vmul.f32 3.8918573e-05, %v4481_v16  ;;  %v4489_v21 = vadd.f32 %v4468_v10, %v387_v18 }
  0xa4   : > { %v424_v22 = vadd.f32 0.00028619796, %v423_v19  ;;  %v435_v23 = vadd.f32 0.001143296, %v434_v20  ;;  %v4495_v25 = vmul.f32 0.70710677, %v4489_v21 }
  0xa5   : > { %v4184_v19 = vld [vmem:[%s5816_s3 + $0x18] sm:$0xff] }
  0xa6   : > { %v425_v26 = vmul.f32 %v424_v22, %v4481_v16  ;;  %v436_v27 = vmul.f32 %v435_v23, %v4481_v16  ;;  %v461_v28 = vmul.f32 %v4495_v25, %v4495_v25  ;;  %972 = vmatpush.bf16.msra.mxu2 %v4184_v19 }
  0xa8   : > { %v426_v30 = vadd.f32 0.0036580483, %v425_v26  ;;  %v437_v31 = vadd.f32 0.014752088, %v436_v27  ;;  %v4509_v34 = vmin.f32 %v461_v28, 16.0 }
  0xa9   : > { %v390_v35 = vpop.f32.mrf.mxu0 }
  0xaa   : > { %v438_v36 = vmul.f32 %v437_v31, %v4481_v16  ;;  %v4514_v37 = vadd.f32 %v4468_v10, %v390_v35  ;;  %v463_v38 = vmul.f32 2.1237322e-06, %v4509_v34  ;;  %v474_v39 = vmul.f32 3.8918573e-05, %v4509_v34 }
  0xab   : > { %v427_v40 = vmul.f32 %v426_v30, %v4481_v16 }
  0xac   : > { %v439_v41 = vadd.f32 0.112945676, %v438_v36  ;;  %v464_v42 = vadd.f32 0.00028619796, %v463_v38  ;;  %v475_v43 = vadd.f32 0.001143296, %v474_v39 }
  0xad   : > { %v4525_v45 = vmul.f32 0.70710677, %v4514_v37  ;;  %v428_v51 = vadd.f32 0.05243302, %v427_v40  ;;  %v4183_v39 = vld [vmem:[%s5816_s3 + $0x10] sm:$0xff]  ;;  %v4209_v40 = vld [vmem:[%s5816_s3 + $0xe0] sm:$0xff] }
  0xae   : > { %v440_v44 = vmul.f32 %v439_v41, %v4481_v16  ;;  %v465_v47 = vmul.f32 %v464_v42, %v4509_v34  ;;  %v476_v48 = vmul.f32 %v475_v43, %v4509_v34  ;;  %973 = vmatpush.bf16.msra.mxu2 %v4183_v39  ;;  %1191 = vmatpush.bf16.msrb.mxu0 %v4209_v40 }
  0xaf   : > { %v501_v53 = vmul.f32 %v4525_v45, %v4525_v45  ;;  %v429_v0 = vmul.f32 %v428_v51, %v4481_v16 }
  0xb0   : > { %v441_v52 = vadd.f32 0.4994258, %v440_v44  ;;  %v466_v54 = vadd.f32 0.0036580483, %v465_v47  ;;  %v477_v55 = vadd.f32 0.014752088, %v476_v48 }
  0xb1   : > { %v392_v56 = vpop.f32.mrf.mxu0  ;;  %v4545_v58 = vmin.f32 %v501_v53, 16.0  ;;  %v430_v11 = vadd.f32 0.18741608, %v429_v0  ;;  %v4190_v44 = vld [vmem:[%s5816_s3 + $0x48] sm:$0xff]  ;;  %v4627_v48 = vmul.f32 0.5, %v4471_v12 }
  0xb2   : > { %v442_v57 = vmul.f32 %v441_v52, %v4481_v16  ;;  %v467_v60 = vmul.f32 %v466_v54, %v4509_v34  ;;  %v478_v61 = vmul.f32 %v477_v55, %v4509_v34  ;;  %v4574_v9 = vadd.f32 %v4468_v10, %v392_v56  ;;  %897 = vmatpush.bf16.msra.mxu1 %v4190_v44 }
  0xb3   : > { %v503_v2 = vmul.f32 2.1237322e-06, %v4545_v58  ;;  %v514_v14 = vmul.f32 3.8918573e-05, %v4545_v58  ;;  %v431_v29 = vmul.f32 %v430_v11, %v4481_v16  ;;  %4331 = vmatpush.bf16.msra.mxu3 %v4190_v44 }
  0xb4   : > { %v4560_v1 = vadd.f32 1.0, %v442_v57  ;;  %v468_v3 = vadd.f32 0.05243302, %v467_v60  ;;  %v479_v4 = vadd.f32 0.112945676, %v478_v61  ;;  %v4189_v57 = vld [vmem:[%s5816_s3 + $0x40] sm:$0xff] }
  0xb5   : > { %v504_v8 = vadd.f32 0.00028619796, %v503_v2  ;;  %v515_v22 = vadd.f32 0.001143296, %v514_v14  ;;  %v4592_v27 = vmul.f32 0.70710677, %v4574_v9 }
  0xb6   : > { %4354 = vrcp.f32 %v4560_v1  ;;  %v469_v6 = vmul.f32 %v468_v3, %v4509_v34  ;;  %v480_v7 = vmul.f32 %v479_v4, %v4509_v34  ;;  %v453_v36 = vand.u32 2147483647, %v4560_v1  ;;  %898 = vmatpush.bf16.msra.mxu1 %v4189_v57 }
  0xb7   : > { %v505_v17 = vmul.f32 %v504_v8, %v4545_v58  ;;  %v516_v31 = vmul.f32 %v515_v22, %v4545_v58  ;;  %v541_v43 = vmul.f32 %v4592_v27, %v4592_v27  ;;  %v432_v49 = vadd.f32 1.1283791, %v431_v29  ;;  %4332 = vmatpush.bf16.msra.mxu3 %v4189_v57  ;;  %v4220_v22 = vld [vmem:[%s5816_s3 + $0x138] sm:$0xff] }
  0xb8   : > { %v470_v15 = vadd.f32 0.18741608, %v469_v6  ;;  %v481_v20 = vadd.f32 0.4994258, %v480_v7  ;;  %v455_v50 = vand.u32 2147483648, %v4560_v1  ;;  %vm449_vm3 = vweird.f32 %v4560_v1 }
  0xb9   : > { %v395_v18 = vpop.f32.mrf.mxu0  ;;  %v506_v26 = vadd.f32 0.0036580483, %v505_v17  ;;  %v517_v42 = vadd.f32 0.014752088, %v516_v31  ;;  %v4636_v53 = vmin.f32 %v541_v43, 16.0  ;;  %vm4639_vm4 = vcmp.eq.f32.partialorder %v453_v36, 8.507059e+37 }
  0xba   : > { %v4585_v23 = vadd.f32 %v4468_v10, %v395_v18  ;;  %v482_v30 = vmul.f32 %v481_v20, %v4509_v34  ;;  %v471_v38 = vmul.f32 %v470_v15, %v4509_v34  ;;  %v433_v63 = vmul.f32 %v432_v49, %v4474_v13  ;;  %v4182_v15 = vld [vmem:[%s5816_s3 + $0x8] sm:$0xff]  ;;  %v4208_v20 = vld [vmem:[%s5816_s3 + $0xd8] sm:$0xff]  ;;  %1302 = vmatpush.bf16.msrb.mxu1 %v4220_v22 }
  0xbb   : > { %v507_v16 = vmul.f32 %v506_v26, %v4545_v58  ;;  %v518_v52 = vmul.f32 %v517_v42, %v4545_v58  ;;  %v456_v0 = vor.u32 1.1754944e-38, %v455_v50  ;;  %v554_v2 = vmul.f32 3.8918573e-05, %v4636_v53  ;;  %974 = vmatpush.bf16.msra.mxu2 %v4182_v15  ;;  %1192 = vmatpush.bf16.msrb.mxu0 %v4208_v20  ;;  %v4181_v42 = vld [vmem:[%s5816_s3] sm:$0xff] }
  0xbc   : > { %v4594_v28 = vpop.eup %4354  ;;  %v4601_v33 = vmul.f32 0.70710677, %v4585_v23  ;;  %v4616_v41 = vadd.f32 1.0, %v482_v30  ;;  %v472_v55 = vadd.f32 1.1283791, %v471_v38  ;;  %v4205_v15 = vld [vmem:[%s5816_s3 + $0xc0] sm:$0xff] }
  0xbd   : > { %v445_v35 = vmul.f32 %v4594_v28, %v4560_v1  ;;  %v508_v47 = vadd.f32 0.05243302, %v507_v16  ;;  %vm450_vm2 = vweird.f32 %v4594_v28  ;;  %v519_v62 = vadd.f32 0.112945676, %v518_v52 }
  0xbe   : > { %v581_v34 = vmul.f32 %v4601_v33, %v4601_v33  ;;  %4356 = vrcp.f32 %v4616_v41  ;;  %v493_v60 = vand.u32 2147483647, %v4616_v41  ;;  %vm451_vm5 = vmor %vm449_vm3, %vm450_vm2  ;;  %v543_v1 = vmul.f32 2.1237322e-06, %v4636_v53 }
  0xbf   : > { %v446_v46 = vsub.f32 1.0, %v445_v35  ;;  %v509_v61 = vmul.f32 %v508_v47, %v4545_v58  ;;  %v495_v4 = vand.u32 2147483648, %v4616_v41  ;;  %v520_v5 = vmul.f32 %v519_v62, %v4545_v58  ;;  %v4207_v47 = vld [vmem:[%s5816_s3 + $0xd0] sm:$0xff]  ;;  %975 = vmatpush.bf16.msra.mxu2 %v4181_v42  ;;  %v4206_v62 = vld [vmem:[%s5816_s3 + $0xc8] sm:$0xff] }
  0xc0   : > { %v4644_v56 = vmin.f32 %v581_v34, 16.0  ;;  %v4670_v8 = vmul.f32 %v472_v55, %v4495_v25  ;;  %v544_v11 = vadd.f32 0.00028619796, %v543_v1  ;;  %v555_v14 = vadd.f32 0.001143296, %v554_v2  ;;  %1193 = vmatpush.bf16.msrb.mxu0 %v4207_v47 }
  0xc1   : > { %v447_v51 = vmul.f32 %v4594_v28, %v446_v46  ;;  %v397_v12 = vpop.f32.mrf.mxu0  ;;  %vm489_vm6 = vweird.f32 %v4616_v41  ;;  %vm4679_vm7 = vcmp.eq.f32.partialorder %v493_v60, 8.507059e+37  ;;  %v510_v25 = vadd.f32 0.18741608, %v509_v61 }
  0xc2   : > { %v583_v13 = vmul.f32 2.1237322e-06, %v4644_v56  ;;  %v521_v24 = vadd.f32 0.4994258, %v520_v5  ;;  %v545_v26 = vmul.f32 %v544_v11, %v4636_v53  ;;  %v594_v35 = vmul.f32 3.8918573e-05, %v4644_v56 }
  0xc3   : > { %v448_v59 = vadd.f32 %v4594_v28, %v447_v51  ;;  %v4695_v36 = vadd.f32 %v4468_v10, %v397_v12  ;;  %v4219_v12 = vld [vmem:[%s5816_s3 + $0x130] sm:$0xff]  ;;  %v496_v57 = vor.u32 1.1754944e-38, %v495_v4  ;;  %v511_v60 = vmul.f32 %v510_v25, %v4545_v58 }
  0xc4   : > { %v4664_v6 = vpop.eup %4356  ;;  %v584_v29 = vadd.f32 0.00028619796, %v583_v13  ;;  %v522_v38 = vmul.f32 %v521_v24, %v4545_v58  ;;  %v546_v16 = vadd.f32 0.0036580483, %v545_v26  ;;  %v595_v44 = vadd.f32 0.001143296, %v594_v35  ;;  %1303 = vmatpush.bf16.msrb.mxu1 %v4219_v12  ;;  %1194 = vmatpush.bf16.msrb.mxu0 %v4206_v62 }
  0xc5   : > { %v452_v3 = vsel %vm451_vm5, %v4594_v28, %v448_v59  ;;  %v485_v18 = vmul.f32 %v4664_v6, %v4616_v41  ;;  %v556_v28 = vmul.f32 %v555_v14, %v4636_v53  ;;  %vm490_vm8 = vweird.f32 %v4664_v6  ;;  %v4218_v41 = vld [vmem:[%s5816_s3 + $0x128] sm:$0xff] }
  0xc6   : > { %v457_v7 = vsel %vm4639_vm4, %v456_v0, %v452_v3  ;;  %v585_v40 = vmul.f32 %v584_v29, %v4644_v56  ;;  %v4710_v49 = vadd.f32 1.0, %v522_v38  ;;  %v547_v50 = vmul.f32 %v546_v16, %v4636_v53  ;;  %vm491_vm9 = vmor %vm489_vm6, %vm490_vm8 }
  0xc7   : > { %v458_v17 = vmul.f32 %v457_v7, %v433_v63  ;;  %v486_v31 = vsub.f32 1.0, %v485_v18  ;;  %v557_v39 = vadd.f32 0.014752088, %v556_v28  ;;  %v596_v59 = vmul.f32 %v595_v44, %v4644_v56 }
  0xc8   : > { %v586_v52 = vadd.f32 0.0036580483, %v585_v40  ;;  %4358 = vrcp.f32 %v4710_v49  ;;  %v548_v63 = vadd.f32 0.05243302, %v547_v50  ;;  %1304 = vmatpush.bf16.msrb.mxu1 %v4218_v41  ;;  %v512_v18 = vadd.f32 1.1283791, %v511_v60  ;;  %1195 = vmatpush.bf16.msrb.mxu0 %v4205_v15 }
  0xc9   : > { %v3323_v30 = vclamps-f32 %v458_v17, 1.0  ;;  %v487_v34 = vmul.f32 %v4664_v6, %v486_v31  ;;  %v400_v46 = vpop.f32.mrf.mxu0  ;;  %v558_v51 = vmul.f32 %v557_v39, %v4636_v53  ;;  %v597_v3 = vadd.f32 0.014752088, %v596_v59  ;;  %v4216_v39 = vld [vmem:[%s5816_s3 + $0x118] sm:$0xff]  ;;  %v4215_v59 = vld [vmem:[%s5816_s3 + $0x110] sm:$0xff]  ;;  %v4214_v15 = vld [vmem:[%s5816_s3 + $0x108] sm:$0xff] }
  0xca   : > { %v4734_v61 = vadd.f32 %v4468_v10, %v400_v46  ;;  %v587_v1 = vmul.f32 %v586_v52, %v4644_v56  ;;  %v549_v5 = vmul.f32 %v548_v63, %v4636_v53  ;;  %v406_v20 = vmul.f32 0.5, %v4489_v21 }
  0xcb   : > { %v741_v43 = vadd.f32 1.0, %v3323_v30  ;;  %v488_v55 = vadd.f32 %v4664_v6, %v487_v34  ;;  %v559_v0 = vadd.f32 0.112945676, %v558_v51  ;;  %v533_v22 = vand.u32 2147483647, %v4710_v49 }
  0xcc   : > { %v588_v7 = vadd.f32 0.05243302, %v587_v1  ;;  %v4755_v14 = vmul.f32 0.70710677, %v4734_v61  ;;  %v550_v30 = vadd.f32 0.18741608, %v549_v5  ;;  %vm529_vm11 = vweird.f32 %v4710_v49 }
  0xcd   : > { %v4718_v54 = vmul.f32 %v741_v43, %v4627_v48  ;;  %v4731_v48 = vmul.f32 0.70710677, %v4695_v36  ;;  %v492_v58 = vsel %vm491_vm9, %v4664_v6, %v488_v55  ;;  %v560_v13 = vmul.f32 %v559_v0, %v4636_v53 }
  0xce   : > { %v497_v2 = vsel %vm4679_vm7, %v496_v57, %v492_v58  ;;  %v598_v6 = vmul.f32 %v597_v3, %v4644_v56  ;;  %v4359_v25 = vpop.eup %4358  ;;  %v661_v31 = vmul.f32 %v4755_v14, %v4755_v14  ;;  %v589_v38 = vmul.f32 %v588_v7, %v4644_v56 }
  0xcf   : > { %778 = vst [vmem:[#allocation2 + $0x11] sm:$0xff] %v4718_v54  ;;  %v498_v4 = vmul.f32 %v497_v2, %v4670_v8  ;;  %v621_v11 = vmul.f32 %v4731_v48, %v4731_v48  ;;  %v4217_v8 = vld [vmem:[%s5816_s3 + $0x120] sm:$0xff]  ;;  %v561_v19 = vadd.f32 0.4994258, %v560_v13  ;;  %v525_v29 = vmul.f32 %v4359_v25, %v4710_v49 }
  0xd0   : > { %v599_v24 = vadd.f32 0.112945676, %v598_v6  ;;  %1305 = vmatpush.bf16.msrb.mxu1 %v4217_v8  ;;  %v535_v43 = vand.u32 2147483648, %v4710_v49  ;;  %vm530_vm10 = vweird.f32 %v4359_v25  ;;  %v551_v51 = vmul.f32 %v550_v30, %v4636_v53 }
  0xd1   : > { %v3324_v17 = vclamps-f32 %v498_v4, 1.0  ;;  %v4765_v26 = vmin.f32 %v621_v11, 16.0  ;;  %v562_v35 = vmul.f32 %v561_v19, %v4636_v53  ;;  %v526_v42 = vsub.f32 1.0, %v525_v29  ;;  %vm531_vm12 = vmor %vm529_vm11, %vm530_vm10  ;;  %v402_v3 = vpop.f32.mrf.mxu0 }
  0xd2   : > { %v600_v16 = vmul.f32 %v599_v24, %v4644_v56  ;;  %v4785_v12 = vmin.f32 %v661_v31, 16.0  ;;  %v513_v55 = vmul.f32 %v512_v18, %v4525_v45  ;;  %v590_v57 = vadd.f32 0.18741608, %v589_v38  ;;  %v814_v24 = vld [vmem:[#allocation2 + $0x1] sm:$0xff] }
  0xd3   : > { %v742_v28 = vadd.f32 1.0, %v3324_v17  ;;  %v623_v21 = vmul.f32 2.1237322e-06, %v4765_v26  ;;  %v634_v34 = vmul.f32 3.8918573e-05, %v4765_v26  ;;  %v4781_v44 = vadd.f32 1.0, %v562_v35 }
  0xd4   : > { %v601_v46 = vadd.f32 0.4994258, %v600_v16  ;;  %v527_v50 = vmul.f32 %v4359_v25, %v526_v42  ;;  %1306 = vmatpush.bf16.msrb.mxu1 %v4216_v39  ;;  %vm534_vm13 = vcmp.eq.f32.partialorder %v533_v22, 8.507059e+37  ;;  %v536_v41 = vor.u32 1.1754944e-38, %v535_v43  ;;  %v4213_v42 = vld [vmem:[%s5816_s3 + $0x100] sm:$0xff] }
  0xd5   : > { %v4777_v40 = vmul.f32 %v742_v28, %v406_v20  ;;  %v624_v47 = vadd.f32 0.00028619796, %v623_v21  ;;  %v635_v52 = vadd.f32 0.001143296, %v634_v34  ;;  %4360 = vrcp.f32 %v4781_v44 }
  0xd6   : > { %v528_v60 = vadd.f32 %v4359_v25, %v527_v50  ;;  %v602_v62 = vmul.f32 %v601_v46, %v4644_v56  ;;  %v663_v58 = vmul.f32 2.1237322e-06, %v4785_v12  ;;  %v552_v0 = vadd.f32 1.1283791, %v551_v51  ;;  %v4833_v50 = vld [vmem:[#allocation2 + $0x10] sm:$0xff] }
  0xd7   : > { %779 = vst [vmem:[#allocation2 + $0x21] sm:$0xff] %v4777_v40  ;;  %v625_v53 = vmul.f32 %v624_v47, %v4765_v26  ;;  %v636_v45 = vmul.f32 %v635_v52, %v4765_v26  ;;  %v573_v49 = vand.u32 2147483647, %v4781_v44  ;;  %v591_v5 = vmul.f32 %v590_v57, %v4644_v56 }
  0xd8   : > { %v532_v63 = vsel %vm531_vm12, %v4359_v25, %v528_v60  ;;  %v4798_v1 = vadd.f32 1.0, %v602_v62  ;;  %1307 = vmatpush.bf16.msrb.mxu1 %v4215_v59  ;;  %v664_v6 = vadd.f32 0.00028619796, %v663_v58  ;;  %v674_v11 = vmul.f32 3.8918573e-05, %v4785_v12 }
  0xd9   : > { %v626_v2 = vadd.f32 0.0036580483, %v625_v53  ;;  %v537_v4 = vsel %vm534_vm13, %v536_v41, %v532_v63  ;;  %v637_v13 = vadd.f32 0.014752088, %v636_v45  ;;  %v407_v17 = vmul.f32 0.5, %v4514_v37 }
  0xda   : > { %v538_v7 = vmul.f32 %v537_v4, %v513_v55  ;;  %4362 = vrcp.f32 %v4798_v1  ;;  %v4811_v56 = vadd.f32 %v4468_v10, %v402_v3  ;;  %v553_v20 = vmul.f32 %v552_v0, %v4592_v27 }
  0xdb   : > { %v4361_v8 = vpop.eup %4360  ;;  %v627_v18 = vmul.f32 %v626_v2, %v4765_v26  ;;  %v638_v19 = vmul.f32 %v637_v13, %v4765_v26  ;;  %vm569_vm14 = vweird.f32 %v4781_v44  ;;  %vm4816_vm15 = vcmp.eq.f32.partialorder %v573_v49, 8.507059e+37 }
  0xdc   : > { %v3325_v25 = vclamps-f32 %v538_v7, 1.0  ;;  %v565_v22 = vmul.f32 %v4361_v8, %v4781_v44  ;;  %v575_v37 = vand.u32 2147483648, %v4781_v44  ;;  %v592_v29 = vadd.f32 1.1283791, %v591_v5  ;;  %1308 = vmatpush.bf16.msrb.mxu1 %v4214_v15 }
  0xdd   : > { %v639_v30 = vadd.f32 0.112945676, %v638_v19  ;;  %v665_v35 = vmul.f32 %v664_v6, %v4785_v12  ;;  %v675_v38 = vadd.f32 0.001143296, %v674_v11  ;;  %v628_v27 = vadd.f32 0.05243302, %v627_v18 }
  0xde   : > { %v743_v31 = vadd.f32 1.0, %v3325_v25  ;;  %v566_v10 = vsub.f32 1.0, %v565_v22  ;;  %v4824_v21 = vmul.f32 0.70710677, %v4811_v56  ;;  %v822_v39 = vpack.c.bf16 %v4718_v54, %v814_v24  ;;  %v4204_v54 = vld [vmem:[%s5816_s3 + $0xb8] sm:$0xff]  ;;  %v1112_v22 = vld [vmem:[#allocation2 + $0x20] sm:$0xff] }
  0xdf   : > { %v640_v16 = vmul.f32 %v639_v30, %v4765_v26  ;;  %vm570_vm0 = vweird.f32 %v4361_v8  ;;  %v676_v47 = vmul.f32 %v675_v38, %v4785_v12  ;;  %v576_v51 = vor.u32 1.1754944e-38, %v575_v37  ;;  %1074 = vmatpush.bf16.msrb.mxu3 %v4204_v54 }
  0xe0   : > { %v4363_v43 = vpop.eup %4362  ;;  %v4830_v34 = vmul.f32 %v743_v31, %v407_v17  ;;  %v567_v46 = vmul.f32 %v4361_v8, %v566_v10  ;;  %v613_v55 = vand.u32 2147483647, %v4798_v1  ;;  %899 = vmatmul.bf16.vlgmr.msra.gmra.mxu1 %v822_v39  ;;  %v666_v60 = vadd.f32 0.0036580483, %v665_v35  ;;  %vm571_vm1 = vmor %vm569_vm14, %vm570_vm0 }
  0xe1   : > { %v605_v52 = vmul.f32 %v4363_v43, %v4798_v1  ;;  %v641_v57 = vadd.f32 0.4994258, %v640_v16  ;;  %v677_v62 = vadd.f32 0.014752088, %v676_v47  ;;  %v701_v53 = vmul.f32 %v4824_v21, %v4824_v21  ;;  %1309 = vmatpush.bf16.msrb.mxu1 %v4213_v42 }
  0xe2   : > { %780 = vst [vmem:[#allocation2 + $0x31] sm:$0xff] %v4830_v34  ;;  %v568_v59 = vadd.f32 %v4361_v8, %v567_v46  ;;  %v629_v45 = vmul.f32 %v628_v27, %v4765_v26  ;;  %v794_v63 = vpack.c.bf16 %v4833_v50, %v4396_v32  ;;  %v615_v2 = vand.u32 2147483648, %v4798_v1  ;;  %v4203_v27 = vld [vmem:[%s5816_s3 + $0xb0] sm:$0xff] }
  0xe3   : > { %v606_v41 = vsub.f32 1.0, %v605_v52  ;;  %v642_v58 = vmul.f32 %v641_v57, %v4765_v26  ;;  %v678_v3 = vmul.f32 %v677_v62, %v4785_v12  ;;  %v4852_v4 = vmin.f32 %v701_v53, 16.0  ;;  %1075 = vmatpush.bf16.msrb.mxu3 %v4203_v27  ;;  %v4202_v62 = vld [vmem:[%s5816_s3 + $0xa8] sm:$0xff]  ;;  %v4243_v27 = vld [vmem:[%s5816_s3 + $0x1f0] sm:$0xff] }
  0xe4   : > { %v572_v0 = vsel %vm571_vm1, %v4361_v8, %v568_v59  ;;  %vm610_vm2 = vweird.f32 %v4363_v43  ;;  %976 = vmatmul.bf16.vlgmr.msra.gmra.mxu2 %v794_v63  ;;  %vm609_vm3 = vweird.f32 %v4798_v1  ;;  %v630_v11 = vadd.f32 0.18741608, %v629_v45 }
  0xe5   : > { %v577_v44 = vsel %vm4816_vm15, %v576_v51, %v572_v0  ;;  %v607_v49 = vmul.f32 %v4363_v43, %v606_v41  ;;  %v4856_v5 = vadd.f32 1.0, %v642_v58  ;;  %v679_v32 = vadd.f32 0.112945676, %v678_v3  ;;  %vm611_vm4 = vmor %vm609_vm3, %vm610_vm2 }
  0xe6   : > { %v578_v13 = vmul.f32 %v577_v44, %v553_v20  ;;  %v703_v7 = vmul.f32 2.1237322e-06, %v4852_v4  ;;  %v667_v15 = vmul.f32 %v666_v60, %v4785_v12  ;;  %v593_v17 = vmul.f32 %v592_v29, %v4601_v33 }
  0xe7   : > { %v608_v6 = vadd.f32 %v4363_v43, %v607_v49  ;;  %4364 = vrcp.f32 %v4856_v5  ;;  %vm614_vm5 = vcmp.eq.f32.partialorder %v613_v55, 8.507059e+37  ;;  %v616_v18 = vor.u32 1.1754944e-38, %v615_v2  ;;  %1076 = vmatpush.bf16.msrb.mxu3 %v4202_v62 }
  0xe8   : > { %v3326_v8 = vclamps-f32 %v578_v13, 1.0  ;;  %v680_v25 = vmul.f32 %v679_v32, %v4785_v12  ;;  %v704_v20 = vadd.f32 0.00028619796, %v703_v7  ;;  %v714_v1 = vmul.f32 3.8918573e-05, %v4852_v4  ;;  %v4227_v13 = vld [vmem:[%s5816_s3 + $0x170] sm:$0xff] }
  0xe9   : > { %v612_v19 = vsel %vm611_vm4, %v4363_v43, %v608_v6  ;;  %v408_v24 = vmul.f32 0.5, %v4574_v9  ;;  %v631_v31 = vmul.f32 %v630_v11, %v4765_v26  ;;  %v668_v10 = vadd.f32 0.05243302, %v667_v15  ;;  %v4201_v32 = vld [vmem:[%s5816_s3 + $0xa0] sm:$0xff] }
  0xea   : > { %v744_v28 = vadd.f32 1.0, %v3326_v8  ;;  %v617_v37 = vsel %vm614_vm5, %v616_v18, %v612_v19  ;;  %v681_v35 = vadd.f32 0.4994258, %v680_v25  ;;  %v715_v29 = vadd.f32 0.001143296, %v714_v1  ;;  %v4226_v1 = vld [vmem:[%s5816_s3 + $0x168] sm:$0xff] }
  0xeb   : > { %v618_v30 = vmul.f32 %v617_v37, %v593_v17  ;;  %v1119_v38 = vpack.c.bf16 %v1112_v22, %v4833_v50  ;;  %v705_v42 = vmul.f32 %v704_v20, %v4852_v4  ;;  %v823_v26 = vpack.c.bf16 %v4830_v34, %v4777_v40  ;;  %v4881_v50 = vld [vmem:[#allocation2 + $0x30] sm:$0xff]  ;;  %1077 = vmatpush.bf16.msrb.mxu3 %v4201_v32 }
  0xec   : > { %v4867_v33 = vmul.f32 %v744_v28, %v408_v24  ;;  %v682_v9 = vmul.f32 %v681_v35, %v4785_v12  ;;  %v409_v43 = vmul.f32 0.5, %v4585_v23  ;;  %v716_v47 = vmul.f32 %v715_v29, %v4852_v4  ;;  %v4228_v23 = vld [vmem:[%s5816_s3 + $0x178] sm:$0xff] }
  0xed   : > { %v4365_v16 = vpop.eup %4364  ;;  %v3327_v39 = vclamps-f32 %v618_v30, 1.0  ;;  %1196 = vmatmul.bf16.vlgmr.msrb.gmra.mxu0 %v1119_v38  ;;  %v632_v52 = vadd.f32 1.1283791, %v631_v31  ;;  %v669_v55 = vmul.f32 %v668_v10, %v4785_v12  ;;  %v655_v59 = vand.u32 2147483648, %v4856_v5  ;;  %1416 = vmatpush.bf16.msrb.mxu2 %v4228_v23  ;;  %v4200_v28 = vld [vmem:[%s5816_s3 + $0x98] sm:$0xff]  ;;  %v4225_v31 = vld [vmem:[%s5816_s3 + $0x160] sm:$0xff] }
  0xee   : > { %781 = vst [vmem:[#allocation2 + $0x41] sm:$0xff] %v4867_v33  ;;  %v645_v46 = vmul.f32 %v4365_v16, %v4856_v5  ;;  %v4884_v57 = vadd.f32 1.0, %v682_v9  ;;  %v717_v60 = vadd.f32 0.014752088, %v716_v47  ;;  %v706_v41 = vadd.f32 0.0036580483, %v705_v42 }
  0xef   : > { %v745_v51 = vadd.f32 1.0, %v3327_v39  ;;  %v4897_v45 = vpack.c.bf16 %v4881_v50, %v1112_v22  ;;  %vm650_vm6 = vweird.f32 %v4365_v16  ;;  %v653_v63 = vand.u32 2147483647, %v4856_v5  ;;  %1078 = vmatpush.bf16.msrb.mxu3 %v4200_v28 }
  0xf0   : > { %v646_v54 = vsub.f32 1.0, %v645_v46  ;;  %4366 = vrcp.f32 %v4884_v57  ;;  %904 = vmatmul.bf16.gmra.mxu1 %v823_v26  ;;  %v718_v0 = vmul.f32 %v717_v60, %v4852_v4  ;;  %v670_v2 = vadd.f32 0.18741608, %v669_v55 }
  0xf1   : > { %v4893_v53 = vmul.f32 %v745_v51, %v409_v43  ;;  %vm649_vm7 = vweird.f32 %v4856_v5  ;;  %v656_v7 = vor.u32 1.1754944e-38, %v655_v59  ;;  %v707_v6 = vmul.f32 %v706_v41, %v4852_v4  ;;  %1417 = vmatpush.bf16.msrb.mxu2 %v4227_v13  ;;  %v4224_v51 = vld [vmem:[%s5816_s3 + $0x158] sm:$0xff] }
  0xf2   : > { %v647_v58 = vmul.f32 %v4365_v16, %v646_v54  ;;  %v719_v49 = vadd.f32 0.112945676, %v718_v0  ;;  %vm651_vm8 = vmor %vm649_vm7, %vm650_vm6  ;;  %v633_v11 = vmul.f32 %v632_v52, %v4731_v48  ;;  %vm654_vm9 = vcmp.eq.f32.partialorder %v653_v63, 8.507059e+37  ;;  %v4244_v48 = vld [vmem:[%s5816_s3 + $0x1f8] sm:$0xff]  ;;  %v4242_v54 = vld [vmem:[%s5816_s3 + $0x1e8] sm:$0xff] }
  0xf3   : > { %782 = vst [vmem:[#allocation2 + $0x51] sm:$0xff] %v4893_v53  ;;  %v824_v3 = vpack.c.bf16 %v4893_v53, %v4867_v33  ;;  %v671_v18 = vmul.f32 %v670_v2, %v4785_v12  ;;  %v708_v22 = vadd.f32 0.05243302, %v707_v6  ;;  %1645 = vmatpush.bf16.msra.mxu0 %v4244_v48  ;;  %v410_v10 = vmul.f32 0.5, %v4695_v36  ;;  %v1225_v36 = vld [vmem:[#allocation2 + $0x11] sm:$0xff]  ;;  %v4241_v63 = vld [vmem:[%s5816_s3 + $0x1e0] sm:$0xff] }
  0xf4   : > { %v648_v44 = vadd.f32 %v4365_v16, %v647_v58  ;;  %981 = vmatmul.bf16.gmra.mxu2 %v4897_v45  ;;  %v720_v5 = vmul.f32 %v719_v49, %v4852_v4  ;;  %v695_v29 = vand.u32 2147483648, %v4884_v57  ;;  %v693_v42 = vand.u32 2147483647, %v4884_v57  ;;  %v4223_v58 = vld [vmem:[%s5816_s3 + $0x150] sm:$0xff]  ;;  %v4252_v49 = vld [vmem:[%s5816_s3 + $0x238] sm:$0xff]  ;;  %v4221_v48 = vld [vmem:[%s5816_s3 + $0x140] sm:$0xff] }
  0xf5   : > { %909 = vmatmul.bf16.vlgmr.msra.gmra.mxu3 %v824_v3  ;;  %v1114_v19 = vld [vmem:[#allocation2 + $0x40] sm:$0xff]  ;;  %1418 = vmatpush.bf16.msrb.mxu2 %v4226_v1  ;;  %v672_v35 = vadd.f32 1.1283791, %v671_v18  ;;  %v709_v26 = vmul.f32 %v708_v22, %v4852_v4  ;;  %vm689_vm11 = vweird.f32 %v4884_v57  ;;  %v1233_v55 = vpack.c.bf16 %v4777_v40, %v1225_v36  ;;  %v4239_v22 = vld [vmem:[%s5816_s3 + $0x1d0] sm:$0xff] }
  0xf6   : > { %v652_v15 = vsel %vm651_vm8, %v4365_v16, %v648_v44  ;;  %v4367_v8 = vpop.eup %4366  ;;  %v721_v24 = vadd.f32 0.4994258, %v720_v5  ;;  %v1120_v30 = vpack.c.bf16 %v1114_v19, %v4881_v50  ;;  %v4199_v16 = vld [vmem:[%s5816_s3 + $0x90] sm:$0xff]  ;;  %v696_v52 = vor.u32 1.1754944e-38, %v695_v29  ;;  %v4236_v44 = vld [vmem:[%s5816_s3 + $0x1b8] sm:$0xff]  ;;  %1759 = vmatpush.bf16.msra.mxu1 %v4252_v49  ;;  %v997_v36 = vld [vmem:[#allocation2 + $0x2] sm:$0xff] }
  0xf7   : > { %v657_v17 = vsel %vm654_vm9, %v656_v7, %v652_v15  ;;  %v685_v20 = vmul.f32 %v4367_v8, %v4884_v57  ;;  %vm690_vm10 = vweird.f32 %v4367_v8  ;;  %1646 = vmatpush.bf16.msra.mxu0 %v4243_v27  ;;  %1079 = vmatpush.bf16.msrb.mxu3 %v4199_v16  ;;  %v4198_v57 = vld [vmem:[%s5816_s3 + $0x88] sm:$0xff]  ;;  %v673_v59 = vmul.f32 %v672_v35, %v4755_v14  ;;  %v4197_v14 = vld [vmem:[%s5816_s3 + $0x80] sm:$0xff] }
  0xf8   : > { %v658_v25 = vmul.f32 %v657_v17, %v633_v11  ;;  %v722_v38 = vmul.f32 %v721_v24, %v4852_v4  ;;  %vm691_vm12 = vmor %vm689_vm11, %vm690_vm10  ;;  %vm694_vm13 = vcmp.eq.f32.partialorder %v693_v42, 8.507059e+37  ;;  %v710_v62 = vadd.f32 0.18741608, %v709_v26  ;;  %v4240_v11 = vld [vmem:[%s5816_s3 + $0x1d8] sm:$0xff] }
  0xf9   : > { %v686_v37 = vsub.f32 1.0, %v685_v20  ;;  %1419 = vmatpush.bf16.msrb.mxu2 %v4225_v31  ;;  %v411_v13 = vmul.f32 0.5, %v4734_v61  ;;  %v4251_v61 = vld [vmem:[%s5816_s3 + $0x230] sm:$0xff]  ;;  %v1234_v31 = vpack.c.bf16 %v4867_v33, %v4830_v34  ;;  %v4237_v34 = vld [vmem:[%s5816_s3 + $0x1c0] sm:$0xff]  ;;  %v412_v16 = vmul.f32 0.5, %v4811_v56 }
  0xfa   : > { %v3328_v12 = vclamps-f32 %v658_v25, 1.0  ;;  %v4941_v43 = vadd.f32 1.0, %v722_v38  ;;  %v4946_v50 = vld [vmem:[#allocation2 + $0x50] sm:$0xff]  ;;  %v711_v3 = vmul.f32 %v710_v62, %v4852_v4  ;;  %v4222_v4 = vld [vmem:[%s5816_s3 + $0x148] sm:$0xff]  ;;  %1760 = vmatpush.bf16.msra.mxu1 %v4251_v61  ;;  %v4249_v33 = vld [vmem:[%s5816_s3 + $0x220] sm:$0xff] }
  0xfb   : > { %v687_v9 = vmul.f32 %v4367_v8, %v686_v37  ;;  %v4962_v40 = vpack.c.bf16 %v4946_v50, %v1114_v19  ;;  %1647 = vmatpush.bf16.msra.mxu0 %v4242_v54  ;;  %1080 = vmatpush.bf16.msrb.mxu3 %v4198_v57  ;;  %v4235_v19 = vld [vmem:[%s5816_s3 + $0x1b0] sm:$0xff]  ;;  %v4233_v56 = vld [vmem:[%s5816_s3 + $0x1a0] sm:$0xff]  ;;  %v4246_v57 = vld [vmem:[%s5816_s3 + $0x208] sm:$0xff] }
  0xfc   : > { %v746_v39 = vadd.f32 1.0, %v3328_v12  ;;  %4368 = vrcp.f32 %v4941_v43  ;;  %v733_v17 = vand.u32 2147483647, %v4941_v43  ;;  %v735_v18 = vand.u32 2147483648, %v4941_v43  ;;  %v998_v26 = vld [vmem:[#allocation2 + $0x12] sm:$0xff]  ;;  %v1340_v54 = vld [vmem:[#allocation2 + $0x22] sm:$0xff] }
  0xfd   : > { %v688_v47 = vadd.f32 %v4367_v8, %v687_v9  ;;  %1201 = vmatmul.bf16.gmra.mxu0 %v1120_v30  ;;  %1420 = vmatpush.bf16.msrb.mxu2 %v4224_v51  ;;  %vm729_vm15 = vweird.f32 %v4941_v43  ;;  %v4234_v9 = vld [vmem:[%s5816_s3 + $0x1a8] sm:$0xff]  ;;  %v4231_v62 = vld [vmem:[%s5816_s3 + $0x190] sm:$0xff] }
  0xfe   : > { %v4943_v46 = vmul.f32 %v746_v39, %v410_v10  ;;  %v736_v28 = vor.u32 1.1754944e-38, %v735_v18  ;;  %vm734_vm1 = vcmp.eq.f32.partialorder %v733_v17, 8.507059e+37  ;;  %v4238_v10 = vld [vmem:[%s5816_s3 + $0x1c8] sm:$0xff]  ;;  %v1002_v49 = vld [vmem:[#allocation2 + $0x52] sm:$0xff] }
  0xff   : > { %v692_v60 = vsel %vm691_vm12, %v4367_v8, %v688_v47  ;;  %1648 = vmatpush.bf16.msra.mxu0 %v4241_v63  ;;  %1081 = vmatpush.bf16.msrb.mxu3 %v4197_v14  ;;  %v712_v8 = vadd.f32 1.1283791, %v711_v3  ;;  %v1005_v47 = vpack.c.bf16 %v998_v26, %v997_v36  ;;  %v1568_v63 = vld [vmem:[#allocation2 + $0x21] sm:$0xff]  ;;  %v1575_v17 = vld [vmem:[#allocation2 + $0x91] sm:$0xff] }
 0x100   : > { %783 = vst [vmem:[#allocation2 + $0x61] sm:$0xff] %v4943_v46  ;;  %v697_v23 = vsel %vm694_vm13, %v696_v52, %v692_v60  ;;  %1310 = vmatmul.bf16.vlgmr.msrb.gmra.mxu1 %v1233_v55  ;;  %v1235_v52 = vpack.c.bf16 %v4943_v46, %v4893_v53  ;;  %v4245_v60 = vld [vmem:[%s5816_s3 + $0x200] sm:$0xff] }
 0x101   : > { %v698_v41 = vmul.f32 %v697_v23, %v673_v59  ;;  %1421 = vmatpush.bf16.msrb.mxu2 %v4223_v58  ;;  %v713_v12 = vmul.f32 %v712_v8, %v4824_v21  ;;  %v4250_v21 = vld [vmem:[%s5816_s3 + $0x228] sm:$0xff]  ;;  %v1347_v59 = vpack.c.bf16 %v1340_v54, %v998_v26  ;;  %v1000_v23 = vld [vmem:[#allocation2 + $0x32] sm:$0xff] }
 0x102   : > { %v4369_v2 = vpop.eup %4368  ;;  %1761 = vmatpush.bf16.msra.mxu1 %v4250_v21  ;;  %v1569_v58 = vld [vmem:[#allocation2 + $0x31] sm:$0xff] }
 0x103   : > { %v3329_v0 = vclamps-f32 %v698_v41, 1.0  ;;  %v725_v7 = vmul.f32 %v4369_v2, %v4941_v43  ;;  %1531 = vmatpush.bf16.msra.mxu3 %v4236_v44  ;;  %vm730_vm14 = vweird.f32 %v4369_v2  ;;  %1649 = vmatpush.bf16.msra.mxu0 %v4240_v11  ;;  %v4248_v43 = vld [vmem:[%s5816_s3 + $0x218] sm:$0xff]  ;;  %v1006_v41 = vpack.c.bf16 %v1000_v23, %v1340_v54  ;;  %v4230_v44 = vld [vmem:[%s5816_s3 + $0x188] sm:$0xff] }
 0x104   : > { %986 = vmatmul.bf16.gmra.mxu2 %v4962_v40  ;;  %vm731_vm0 = vmor %vm729_vm15, %vm730_vm14 }
 0x105   : > { %v747_v32 = vadd.f32 1.0, %v3329_v0  ;;  %v726_v5 = vsub.f32 1.0, %v725_v7  ;;  %1422 = vmatpush.bf16.msrb.mxu2 %v4222_v4  ;;  %v1576_v0 = vpack.c.bf16 %v1569_v58, %v1568_v63  ;;  %v1570_v7 = vld [vmem:[#allocation2 + $0x41] sm:$0xff] }
 0x106   : > { %1762 = vmatpush.bf16.msra.mxu1 %v4249_v33  ;;  %v1577_v4 = vpack.c.bf16 %v4893_v53, %v1570_v7 }
 0x107   : > { %v1116_v6 = vld [vmem:[#allocation2 + $0x60] sm:$0xff]  ;;  %v4989_v15 = vmul.f32 %v747_v32, %v411_v13  ;;  %v727_v25 = vmul.f32 %v4369_v2, %v726_v5  ;;  %1532 = vmatpush.bf16.msra.mxu3 %v4235_v19  ;;  %1650 = vmatpush.bf16.msra.mxu0 %v4239_v22 }
 0x108   : > { %v1121_v20 = vpack.c.bf16 %v1116_v6, %v4946_v50  ;;  %v4247_v50 = vld [vmem:[%s5816_s3 + $0x210] sm:$0xff]  ;;  %v4229_v13 = vld [vmem:[%s5816_s3 + $0x180] sm:$0xff] }
 0x109   : > { %784 = vst [vmem:[#allocation2 + $0x71] sm:$0xff] %v4989_v15  ;;  %v5003_v1 = vpack.c.bf16 %v4989_v15, %v4943_v46  ;;  %v728_v24 = vadd.f32 %v4369_v2, %v727_v25  ;;  %1423 = vmatpush.bf16.msrb.mxu2 %v4221_v48  ;;  %v4232_v46 = vld [vmem:[%s5816_s3 + $0x198] sm:$0xff] }
 0x10a   : > { %1763 = vmatpush.bf16.msra.mxu1 %v4248_v43  ;;  %v1689_v25 = vld [vmem:[#allocation2 + $0x92] sm:$0xff] }
 0x10b   : > { %914 = vmatmul.bf16.gmra.mxu3 %v5003_v1  ;;  %v732_v37 = vsel %vm731_vm0, %v4369_v2, %v728_v24  ;;  %1651 = vmatpush.bf16.msra.mxu0 %v4238_v10  ;;  %v1342_v2 = vld [vmem:[#allocation2 + $0x42] sm:$0xff] }
 0x10c   : > { %v737_v30 = vsel %vm734_vm1, %v736_v28, %v732_v37  ;;  %1533 = vmatpush.bf16.msra.mxu3 %v4234_v9  ;;  %v1348_v3 = vpack.c.bf16 %v1342_v2, %v1000_v23  ;;  %v1007_v32 = vpack.c.bf16 %v1002_v49, %v1342_v2  ;;  %v5088_v10 = vld [vmem:[#allocation2] sm:$0xff] }
 0x10d   : > { %1206 = vmatmul.bf16.gmra.mxu0 %v1121_v20  ;;  %v738_v35 = vmul.f32 %v737_v30, %v713_v12 }
 0x10e   : > { %1764 = vmatpush.bf16.msra.mxu1 %v4247_v50 }
 0x10f   : > { %v3330_v38 = vclamps-f32 %v738_v35, 1.0  ;;  %1652 = vmatpush.bf16.msra.mxu0 %v4237_v34 }
 0x110   : > { %v793_v29 = vld [vmem:[#allocation2 + $0x70] sm:$0xff]  ;;  %1315 = vmatmul.bf16.gmra.mxu1 %v1234_v31  ;;  %1534 = vmatpush.bf16.msra.mxu3 %v4233_v56 }
 0x111   : > { %v5022_v27 = vpack.c.bf16 %v793_v29, %v1116_v6  ;;  %v748_v39 = vadd.f32 1.0, %v3330_v38  ;;  %v1344_v6 = vld [vmem:[#allocation2 + $0x62] sm:$0xff] }
 0x112   : > { %1765 = vmatpush.bf16.msra.mxu1 %v4246_v57  ;;  %v1349_v11 = vpack.c.bf16 %v1344_v6, %v1002_v49 }
 0x113   : > { %v5035_v42 = vmul.f32 %v748_v39, %v412_v16 }
 0x114   : > { %991 = vmatmul.bf16.gmra.mxu2 %v5022_v27  ;;  %1535 = vmatpush.bf16.msra.mxu3 %v4232_v46 }
 0x115   : > { %785 = vst [vmem:[#allocation2 + $0x81] sm:$0xff] %v5035_v42  ;;  %v1236_v14 = vpack.c.bf16 %v5035_v42, %v4989_v15  ;;  %v1004_v15 = vld [vmem:[#allocation2 + $0x72] sm:$0xff]  ;;  %v1579_v18 = vpack.c.bf16 %v1575_v17, %v5035_v42 }
 0x116   : > { %1766 = vmatpush.bf16.msra.mxu1 %v4245_v60  ;;  %v1008_v5 = vpack.c.bf16 %v1004_v15, %v1344_v6 }
 0x118   : > { %1536 = vmatpush.bf16.msra.mxu3 %v4231_v62 }
 0x11b   : > { %1082 = vmatmul.bf16.vlgmr.msrb.gmra.mxu3 %v1005_v47 }
 0x11c   : > { %v5047_v51 = vld [vmem:[#allocation2 + $0x80] sm:$0xff]  ;;  %1537 = vmatpush.bf16.msra.mxu3 %v4230_v44 }
 0x11d   : > { %v1122_v55 = vpack.c.bf16 %v5047_v51, %v793_v29  ;;  %v1346_v61 = vld [vmem:[#allocation2 + $0x82] sm:$0xff]  ;;  %v1465_v35 = vpack.c.bf16 %v5088_v10, %v5047_v51 }
 0x11e   : > { %v1350_v8 = vpack.c.bf16 %v1346_v61, %v1004_v15  ;;  %v1693_v48 = vpack.c.bf16 %v1689_v25, %v1346_v61 }
 0x11f   : > { %1211 = vmatmul.bf16.gmra.mxu0 %v1122_v55 }
 0x120   : > { %1320 = vmatmul.bf16.gmra.mxu1 %v1235_v52  ;;  %1538 = vmatpush.bf16.msra.mxu3 %v4229_v13 }
 0x124   : > { %1424 = vmatmul.bf16.vlgmr.msrb.gmra.mxu2 %v1347_v59 }
 0x12b   : > { %1087 = vmatmul.bf16.gmra.mxu3 %v1006_v41 }
 0x12f   : > { %1653 = vmatmul.bf16.vlgmr.msra.gmra.mxu0 %v1576_v0 }
 0x130   : > { %1325 = vmatmul.bf16.gmra.mxu1 %v1236_v14 }
 0x134   : > { %1429 = vmatmul.bf16.gmra.mxu2 %v1348_v3 }
 0x13b   : > { %1092 = vmatmul.bf16.gmra.mxu3 %v1007_v32 }
 0x13f   : > { %1658 = vmatmul.bf16.gmra.mxu0 %v1577_v4 }
 0x140   : > { %1767 = vmatmul.bf16.vlgmr.msra.gmra.mxu1 %v1006_v41 }
 0x144   : > { %1434 = vmatmul.bf16.gmra.mxu2 %v1349_v11 }
 0x14b   : > { %1097 = vmatmul.bf16.gmra.mxu3 %v1008_v5 }
 0x14f   : > { %1663 = vmatmul.bf16.gmra.mxu0 %v5003_v1 }
 0x150   : > { %1772 = vmatmul.bf16.gmra.mxu1 %v1007_v32 }
 0x154   : > { %1439 = vmatmul.bf16.gmra.mxu2 %v1350_v8 }
 0x15b   : > { %1539 = vmatmul.bf16.vlgmr.msra.gmra.mxu3 %v4897_v45 }
 0x15d   : > { %v900_v53 = vpop.f32.mrf.mxu1 }
 0x15f   : > { %1668 = vmatmul.bf16.gmra.mxu0 %v1579_v18 }
 0x160   : > { %1777 = vmatmul.bf16.gmra.mxu1 %v1008_v5 }
 0x165   : > { %v902_v20 = vpop.f32.mrf.mxu1 }
 0x167   : > { %v977_v19 = vpop.f32.mrf.mxu2 }
 0x168   : > { %v978_v49 = vadd.f32 %v977_v19, %v900_v53 }
 0x16a   : > { %v1197_v31 = vpop.f32.mrf.mxu0 }
 0x16b   : > { %1544 = vmatmul.bf16.gmra.mxu3 %v4962_v40 }
 0x16d   : > { %v5079_v1 = vpop.f32.mrf.mxu1 }
 0x16f   : > { %v979_v22 = vpop.f32.mrf.mxu2 }
 0x170   : > { %1782 = vmatmul.bf16.gmra.mxu1 %v1693_v48  ;;  %v980_v15 = vadd.f32 %v979_v22, %v902_v20 }
 0x175   : > { %v5084_v12 = vpop.f32.mrf.mxu1 }
 0x177   : > { %v5077_v24 = vpop.f32.mrf.mxu2 }
 0x178   : > { %v910_v28 = vpop.f32.mrf.mxu3  ;;  %v983_v53 = vadd.f32 %v5077_v24, %v5079_v1 }
 0x17b   : > { %1549 = vmatmul.bf16.gmra.mxu3 %v5022_v27  ;;  %v1199_v27 = vpop.f32.mrf.mxu0 }
 0x17d   : > { %v1311_v29 = vpop.f32.mrf.mxu1 }
 0x17f   : > { %v5082_v45 = vpop.f32.mrf.mxu2 }
 0x180   : > { %v5086_v37 = vpop.f32.mrf.mxu3 }
 0x183   : > { %v1202_v9 = vpop.f32.mrf.mxu0 }
 0x185   : > { %v1313_v34 = vpop.f32.mrf.mxu1 }
 0x187   : > { %v987_v30 = vpop.f32.mrf.mxu2 }
 0x188   : > { %v988_v40 = vadd.f32 %v987_v30, %v910_v28 }
 0x18b   : > { %1554 = vmatmul.bf16.gmra.mxu3 %v1465_v35  ;;  %v5096_v43 = vpop.f32.mrf.mxu0 }
 0x18d   : > { %v1316_v36 = vpop.f32.mrf.mxu1 }
 0x18e   : > { %v915_v21 = vpop.f32.mrf.mxu3 }
 0x18f   : > { %v5092_v38 = vpop.f32.mrf.mxu2 }
 0x193   : > { %v1207_v50 = vpop.f32.mrf.mxu0 }
 0x195   : > { %v5098_v56 = vpop.f32.mrf.mxu1 }
 0x196   : > { %v5094_v33 = vpop.f32.mrf.mxu3 }
 0x197   : > { %v992_v16 = vpop.f32.mrf.mxu2 }
 0x198   : > { %v993_v39 = vadd.f32 %v992_v16, %v915_v21 }
 0x19b   : > { %v5102_v54 = vpop.f32.mrf.mxu0 }
 0x19d   : > { %v1321_v52 = vpop.f32.mrf.mxu1 }
 0x19e   : > { %v1083_v42 = vpop.f32.mrf.mxu3 }
 0x19f   : > { %v5100_v51 = vpop.f32.mrf.mxu2  ;;  %v1103_v7 = vadd.f32 %v1083_v42, %v978_v49 }
 0x1a1   : > { %v1217_v11 = vadd.f32 %v1197_v31, %v1103_v7 }
 0x1a3   : > { %v1212_v41 = vpop.f32.mrf.mxu0  ;;  %v1331_v8 = vadd.f32 %v1311_v29, %v1217_v11 }
 0x1a5   : > { %v5104_v59 = vpop.f32.mrf.mxu1 }
 0x1a6   : > { %v1085_v26 = vpop.f32.mrf.mxu3 }
 0x1a7   : > { %v1425_v57 = vpop.f32.mrf.mxu2  ;;  %v1104_v17 = vadd.f32 %v1085_v26, %v980_v15  ;;  %v985_v26 = vadd.f32 %v5082_v45, %v5084_v12 }
 0x1a8   : > { %v1445_v25 = vadd.f32 %v1425_v57, %v1331_v8  ;;  %v4276_v8 = vld [vmem:[%s5818_s5 + $0xb8] sm:$0xff] }
 0x1a9   : > { %v1218_v28 = vadd.f32 %v1199_v27, %v1104_v17  ;;  %2477 = vmatpush.bf16.msrb.mxu0 %v4276_v8 }
 0x1ab   : > { %v5110_v2 = vpop.f32.mrf.mxu0  ;;  %v1332_v31 = vadd.f32 %v1313_v34, %v1218_v28 }
 0x1ad   : > { %v1326_v14 = vpop.f32.mrf.mxu1 }
 0x1ae   : > { %v1088_v47 = vpop.f32.mrf.mxu3 }
 0x1af   : > { %v1427_v58 = vpop.f32.mrf.mxu2  ;;  %v1105_v22 = vadd.f32 %v1088_v47, %v983_v53  ;;  %v4268_v47 = vld [vmem:[%s5818_s5 + $0x78] sm:$0xff] }
 0x1b0   : > { %v1446_v21 = vadd.f32 %v1427_v58, %v1332_v31  ;;  %2294 = vmatpush.bf16.msra.mxu2 %v4268_v47  ;;  %v4267_v58 = vld [vmem:[%s5818_s5 + $0x70] sm:$0xff]  ;;  %v995_v47 = vadd.f32 %v5100_v51, %v5094_v33 }
 0x1b1   : > { %v1219_v42 = vadd.f32 %v1202_v9, %v1105_v22 }
 0x1b3   : > { %v1654_v5 = vpop.f32.mrf.mxu0  ;;  %v1333_v57 = vadd.f32 %v1316_v36, %v1219_v42 }
 0x1b4   : > { %2295 = vmatpush.bf16.msra.mxu2 %v4267_v58 }
 0x1b5   : > { %v5112_v32 = vpop.f32.mrf.mxu1 }
 0x1b6   : > { %v1090_v55 = vpop.f32.mrf.mxu3 }
 0x1b7   : > { %v1430_v44 = vpop.f32.mrf.mxu2 }
 0x1bb   : > { %v1656_v20 = vpop.f32.mrf.mxu0 }
 0x1bd   : > { %v1768_v18 = vpop.f32.mrf.mxu1 }
 0x1be   : > { %v1093_v60 = vpop.f32.mrf.mxu3 }
 0x1bf   : > { %v1107_v46 = vadd.f32 %v1093_v60, %v988_v40  ;;  %v1432_v61 = vpop.f32.mrf.mxu2  ;;  %v5123_v40 = vld [vmem:[%s5817_s4] ss:$0 sm:$0xff] }
 0x1c1   : > { %v1221_v23 = vadd.f32 %v1207_v50, %v1107_v46  ;;  %v1447_v46 = vadd.f32 %v1430_v44, %v1333_v57 }
 0x1c3   : > { %v5106_v62 = vadd.f32 %v1321_v52, %v1221_v23  ;;  %v1106_v52 = vadd.f32 %v1090_v55, %v985_v26  ;;  %v1659_v23 = vpop.f32.mrf.mxu0 }
 0x1c5   : > { %v1770_v27 = vpop.f32.mrf.mxu1  ;;  %v1220_v55 = vadd.f32 %v5096_v43, %v1106_v52  ;;  %v4266_v43 = vld [vmem:[%s5818_s5 + $0x68] sm:$0xff] }
 0x1c6   : > { %v5108_v63 = vpop.f32.mrf.mxu3  ;;  %2296 = vmatpush.bf16.msra.mxu2 %v4266_v43  ;;  %v4258_v43 = vld [vmem:[%s5818_s5 + $0x28] sm:$0xff] }
 0x1c7   : > { %v5125_v29 = vpop.f32.mrf.mxu2  ;;  %v1334_v17 = vadd.f32 %v5098_v56, %v1220_v55 }
 0x1c9   : > { %v1448_v53 = vadd.f32 %v1432_v61, %v1334_v17 }
 0x1cd   : > { %v1773_v49 = vpop.f32.mrf.mxu1 }
 0x1ce   : > { %v1098_v0 = vpop.f32.mrf.mxu3 }
 0x1cf   : > { %v1109_v3 = vadd.f32 %v1098_v0, %v993_v39  ;;  %v5151_v36 = vpop.f32.mrf.mxu2 }
 0x1d1   : > { %v1223_v13 = vadd.f32 %v1212_v41, %v1109_v3 }
 0x1d3   : > { %v5114_v4 = vadd.f32 %v1326_v14, %v1223_v13 }
 0x1d6   : > { %v5116_v6 = vpop.f32.mrf.mxu3 }
 0x1d7   : > { %v1440_v42 = vpop.f32.mrf.mxu2  ;;  %v1110_v58 = vadd.f32 %v5116_v6, %v995_v47 }
 0x1de   : > { %v1540_v48 = vpop.f32.mrf.mxu3 }
 0x1df   : > { %v1560_v30 = vadd.f32 %v1540_v48, %v1445_v25  ;;  %v990_v25 = vadd.f32 %v5092_v38, %v5086_v37  ;;  %v4265_v37 = vld [vmem:[%s5818_s5 + $0x60] sm:$0xff] }
 0x1e0   : > { %2297 = vmatpush.bf16.msra.mxu2 %v4265_v37  ;;  %v4257_v37 = vld [vmem:[%s5818_s5 + $0x20] sm:$0xff] }
 0x1e1   : > { %v1674_v19 = vadd.f32 %v1654_v5, %v1560_v30  ;;  %v4260_v5 = vld [vmem:[%s5818_s5 + $0x38] sm:$0xff]  ;;  %v1108_v31 = vadd.f32 %v5108_v63, %v990_v25  ;;  %v1661_v63 = vpop.f32.mrf.mxu0 }
 0x1e2   : > { %2371 = vmatpush.bf16.msrb.mxu3 %v4260_v5  ;;  %v4274_v5 = vld [vmem:[%s5818_s5 + $0xa8] sm:$0xff] }
 0x1e3   : > { %v1788_v35 = vadd.f32 %v1768_v18, %v1674_v19 }
 0x1e5   : > { %v5128_v16 = vadd.f32 %v5123_v40, %v1788_v35 }
 0x1e6   : > { %v1542_v39 = vpop.f32.mrf.mxu3 }
 0x1e7   : > { %v5131_v24 = vmul.f32 0.70710677, %v5128_v16  ;;  %v1561_v1 = vadd.f32 %v1542_v39, %v1446_v21 }
 0x1e9   : > { %v1824_v34 = vmul.f32 %v5131_v24, %v5131_v24  ;;  %v1675_v50 = vadd.f32 %v1656_v20, %v1561_v1 }
 0x1eb   : > { %v5140_v60 = vmin.f32 %v1824_v34, 16.0  ;;  %v1789_v9 = vadd.f32 %v1770_v27, %v1675_v50  ;;  %v1222_v50 = vadd.f32 %v5102_v54, %v1108_v31 }
 0x1ed   : > { %v1826_v41 = vmul.f32 2.1237322e-06, %v5140_v60  ;;  %v1837_v45 = vmul.f32 3.8918573e-05, %v5140_v60  ;;  %v5145_v12 = vadd.f32 %v5123_v40, %v1789_v9  ;;  %v4264_v9 = vld [vmem:[%s5818_s5 + $0x58] sm:$0xff] }
 0x1ee   : > { %v1545_v14 = vpop.f32.mrf.mxu3  ;;  %2298 = vmatpush.bf16.msra.mxu2 %v4264_v9 }
 0x1ef   : > { %v1827_v0 = vadd.f32 0.00028619796, %v1826_v41  ;;  %v1838_v3 = vadd.f32 0.001143296, %v1837_v45  ;;  %v1562_v44 = vadd.f32 %v1545_v14, %v1447_v46  ;;  %v5154_v13 = vmul.f32 0.70710677, %v5145_v12  ;;  %v1775_v41 = vpop.f32.mrf.mxu1 }
 0x1f0   : > { %v4259_v46 = vld [vmem:[%s5818_s5 + $0x30] sm:$0xff] }
 0x1f1   : > { %v1828_v7 = vmul.f32 %v1827_v0, %v5140_v60  ;;  %v1839_v11 = vmul.f32 %v1838_v3, %v5140_v60  ;;  %v1676_v15 = vadd.f32 %v1659_v23, %v1562_v44  ;;  %v1864_v18 = vmul.f32 %v5154_v13, %v5154_v13  ;;  %v4275_v23 = vld [vmem:[%s5818_s5 + $0xb0] sm:$0xff]  ;;  %2372 = vmatpush.bf16.msrb.mxu3 %v4259_v46 }
 0x1f2   : > { %2478 = vmatpush.bf16.msrb.mxu0 %v4275_v23 }
 0x1f3   : > { %v1829_v48 = vadd.f32 0.0036580483, %v1828_v7  ;;  %v1840_v28 = vadd.f32 0.014752088, %v1839_v11  ;;  %v1790_v30 = vadd.f32 %v1773_v49, %v1676_v15  ;;  %v5172_v19 = vmin.f32 %v1864_v18, 16.0  ;;  %v4284_v49 = vld [vmem:[%s5818_s5 + $0xf8] sm:$0xff] }
 0x1f4   : > { %v1449_v7 = vadd.f32 %v5125_v29, %v5106_v62  ;;  %v1336_v11 = vadd.f32 %v5104_v59, %v1222_v50  ;;  %2591 = vmatpush.bf16.msrb.mxu1 %v4284_v49  ;;  %v1224_v18 = vadd.f32 %v5110_v2, %v1110_v58  ;;  %v4263_v2 = vld [vmem:[%s5818_s5 + $0x50] sm:$0xff]  ;;  %v5262_v50 = vmul.f32 0.5, %v5128_v16  ;;  %v4256_v16 = vld [vmem:[%s5818_s5 + $0x18] sm:$0xff] }
 0x1f5   : > { %v1830_v20 = vmul.f32 %v1829_v48, %v5140_v60  ;;  %v1841_v56 = vmul.f32 %v1840_v28, %v5140_v60  ;;  %v5178_v22 = vadd.f32 %v5123_v40, %v1790_v30  ;;  %v1866_v38 = vmul.f32 2.1237322e-06, %v5172_v19  ;;  %2373 = vmatpush.bf16.msrb.mxu3 %v4258_v43  ;;  %2299 = vmatpush.bf16.msra.mxu2 %v4263_v2 }
 0x1f6   : > { %v1877_v61 = vmul.f32 3.8918573e-05, %v5172_v19  ;;  %v1547_v35 = vpop.f32.mrf.mxu3  ;;  %2479 = vmatpush.bf16.msrb.mxu0 %v4274_v5 }
 0x1f7   : > { %v1831_v21 = vadd.f32 0.05243302, %v1830_v20  ;;  %v1842_v27 = vadd.f32 0.112945676, %v1841_v56  ;;  %v1563_v39 = vadd.f32 %v1547_v35, %v1448_v53  ;;  %v1867_v1 = vadd.f32 0.00028619796, %v1866_v38 }
 0x1f8   : > { %v1878_v26 = vadd.f32 0.001143296, %v1877_v61  ;;  %v5186_v34 = vmul.f32 0.70710677, %v5178_v22  ;;  %v5236_v56 = vadd.f32 %v5151_v36, %v1336_v11  ;;  %v4273_v38 = vld [vmem:[%s5818_s5 + $0xa0] sm:$0xff]  ;;  %v1442_v61 = vpop.f32.mrf.mxu2 }
 0x1f9   : > { %v1843_v52 = vmul.f32 %v1842_v27, %v5140_v60  ;;  %v1677_v57 = vadd.f32 %v1661_v63, %v1563_v39  ;;  %v1832_v33 = vmul.f32 %v1831_v21, %v5140_v60  ;;  %v1868_v51 = vmul.f32 %v1867_v1, %v5172_v19  ;;  %v4283_v39 = vld [vmem:[%s5818_s5 + $0xf0] sm:$0xff]  ;;  %v1664_v63 = vpop.f32.mrf.mxu0  ;;  %2374 = vmatpush.bf16.msrb.mxu3 %v4257_v37 }
 0x1fa   : > { %v1879_v54 = vmul.f32 %v1878_v26, %v5172_v19  ;;  %v1904_v45 = vmul.f32 %v5186_v34, %v5186_v34  ;;  %v5256_v1 = vadd.f32 %v1440_v42, %v5114_v4  ;;  %v1338_v26 = vadd.f32 %v5112_v32, %v1224_v18  ;;  %2480 = vmatpush.bf16.msrb.mxu0 %v4273_v38  ;;  %v4262_v4 = vld [vmem:[%s5818_s5 + $0x48] sm:$0xff] }
 0x1fb   : > { %v1844_v55 = vadd.f32 0.4994258, %v1843_v52  ;;  %v1791_v14 = vadd.f32 %v1775_v41, %v1677_v57  ;;  %v1869_v0 = vadd.f32 0.0036580483, %v1868_v51  ;;  %v1833_v8 = vadd.f32 0.18741608, %v1832_v33  ;;  %2592 = vmatpush.bf16.msrb.mxu1 %v4283_v39  ;;  %2300 = vmatpush.bf16.msra.mxu2 %v4262_v4 }
 0x1fc   : > { %v1880_v3 = vadd.f32 0.014752088, %v1879_v54  ;;  %v5207_v44 = vmin.f32 %v1904_v45, 16.0  ;;  %v5267_v42 = vadd.f32 %v1442_v61, %v1338_v26  ;;  %v4272_v41 = vld [vmem:[%s5818_s5 + $0x98] sm:$0xff]  ;;  %v4282_v33 = vld [vmem:[%s5818_s5 + $0xe8] sm:$0xff]  ;;  %v4255_v26 = vld [vmem:[%s5818_s5 + $0x10] sm:$0xff] }
 0x1fd   : > { %v1845_v6 = vmul.f32 %v1844_v55, %v5140_v60  ;;  %v5217_v15 = vadd.f32 %v5123_v40, %v1791_v14  ;;  %v1870_v17 = vmul.f32 %v1869_v0, %v5172_v19  ;;  %v1834_v35 = vmul.f32 %v1833_v8, %v5140_v60  ;;  %v1778_v0 = vpop.f32.mrf.mxu1  ;;  %2375 = vmatpush.bf16.msrb.mxu3 %v4256_v16 }
 0x1fe   : > { %v1881_v62 = vmul.f32 %v1880_v3, %v5172_v19  ;;  %v1906_v59 = vmul.f32 2.1237322e-06, %v5207_v44  ;;  %v1550_v29 = vpop.f32.mrf.mxu3  ;;  %v1917_v48 = vmul.f32 3.8918573e-05, %v5207_v44  ;;  %2481 = vmatpush.bf16.msrb.mxu0 %v4272_v41  ;;  %v4261_v41 = vld [vmem:[%s5818_s5 + $0x40] sm:$0xff] }
 0x1ff   : > { %v5229_v25 = vadd.f32 1.0, %v1845_v6  ;;  %v5233_v28 = vmul.f32 0.70710677, %v5217_v15  ;;  %v1871_v30 = vadd.f32 0.05243302, %v1870_v17  ;;  %v1564_v20 = vadd.f32 %v1550_v29, %v1449_v7  ;;  %2593 = vmatpush.bf16.msrb.mxu1 %v4282_v33  ;;  %2301 = vmatpush.bf16.msra.mxu2 %v4261_v41 }
 0x200   : > { %v1882_v53 = vadd.f32 0.112945676, %v1881_v62  ;;  %v1907_v31 = vadd.f32 0.00028619796, %v1906_v59  ;;  %v1918_v47 = vadd.f32 0.001143296, %v1917_v48 }
 0x201   : > { %4370 = vrcp.f32 %v5229_v25  ;;  %v1872_v36 = vmul.f32 %v1871_v30, %v5172_v19  ;;  %v1944_v60 = vmul.f32 %v5233_v28, %v5233_v28  ;;  %v1678_v9 = vadd.f32 %v1664_v63, %v1564_v20  ;;  %v1666_v38 = vpop.f32.mrf.mxu0  ;;  %2376 = vmatpush.bf16.msrb.mxu3 %v4255_v26 }
 0x202   : > { %v1883_v21 = vmul.f32 %v1882_v53, %v5172_v19  ;;  %v1908_v27 = vmul.f32 %v1907_v31, %v5207_v44  ;;  %v1919_v46 = vmul.f32 %v1918_v47, %v5207_v44  ;;  %v1835_v51 = vadd.f32 1.1283791, %v1834_v35 }
 0x203   : > { %v1873_v52 = vadd.f32 0.18741608, %v1872_v36  ;;  %v5270_v23 = vmin.f32 %v1944_v60, 16.0  ;;  %v1856_v54 = vand.u32 2147483647, %v5229_v25  ;;  %v1858_v43 = vand.u32 2147483648, %v5229_v25 }
 0x204   : > { %v1884_v57 = vadd.f32 0.4994258, %v1883_v21  ;;  %v1909_v32 = vadd.f32 0.0036580483, %v1908_v27  ;;  %v1920_v49 = vadd.f32 0.014752088, %v1919_v46  ;;  %v1792_v8 = vadd.f32 %v1778_v0, %v1678_v9 }
 0x205   : > { %v1874_v45 = vmul.f32 %v1873_v52, %v5172_v19  ;;  %v1946_v7 = vmul.f32 2.1237322e-06, %v5270_v23  ;;  %v1957_v11 = vmul.f32 3.8918573e-05, %v5270_v23  ;;  %v1836_v29 = vmul.f32 %v1835_v51, %v5131_v24  ;;  %v1780_v51 = vpop.f32.mrf.mxu1 }
 0x206   : > { %v1885_v58 = vmul.f32 %v1884_v57, %v5172_v19  ;;  %v1552_v55 = vpop.f32.mrf.mxu3  ;;  %v1910_v3 = vmul.f32 %v1909_v32, %v5207_v44  ;;  %v1921_v17 = vmul.f32 %v1920_v49, %v5207_v44  ;;  %vm1852_vm2 = vweird.f32 %v5229_v25  ;;  %v4271_v57 = vld [vmem:[%s5818_s5 + $0x90] sm:$0xff]  ;;  %v4254_v49 = vld [vmem:[%s5818_s5 + $0x8] sm:$0xff] }
 0x207   : > { %v4371_v14 = vpop.eup %4370  ;;  %v1947_v62 = vadd.f32 0.00028619796, %v1946_v7  ;;  %v1958_v59 = vadd.f32 0.001143296, %v1957_v11  ;;  %v1875_v48 = vadd.f32 1.1283791, %v1874_v45  ;;  %v5299_v37 = vadd.f32 %v5123_v40, %v1792_v8  ;;  %2482 = vmatpush.bf16.msrb.mxu0 %v4271_v57  ;;  %2377 = vmatpush.bf16.msrb.mxu3 %v4254_v49 }
 0x208   : > { %v1848_v6 = vmul.f32 %v4371_v14, %v5229_v25  ;;  %v5289_v5 = vadd.f32 1.0, %v1885_v58  ;;  %v1911_v19 = vadd.f32 0.05243302, %v1910_v3  ;;  %vm1853_vm3 = vweird.f32 %v4371_v14  ;;  %v4281_v25 = vld [vmem:[%s5818_s5 + $0xe0] sm:$0xff]  ;;  %v4270_v7 = vld [vmem:[%s5818_s5 + $0x88] sm:$0xff] }
 0x209   : > { %v1922_v53 = vadd.f32 0.112945676, %v1921_v17  ;;  %v1948_v20 = vmul.f32 %v1947_v62, %v5270_v23  ;;  %v1959_v2 = vmul.f32 %v1958_v59, %v5270_v23  ;;  %vm5301_vm4 = vcmp.eq.f32.partialorder %v1856_v54, 8.507059e+37  ;;  %vm5315_vm5 = vmor %vm1852_vm2, %vm1853_vm3  ;;  %2594 = vmatpush.bf16.msrb.mxu1 %v4281_v25 }
 0x20a   : > { %v1849_v18 = vsub.f32 1.0, %v1848_v6  ;;  %4372 = vrcp.f32 %v5289_v5  ;;  %v1912_v30 = vmul.f32 %v1911_v19, %v5207_v44  ;;  %v1859_v61 = vor.u32 1.1754944e-38, %v1858_v43 }
 0x20b   : > { %v1923_v36 = vmul.f32 %v1922_v53, %v5207_v44  ;;  %v5307_v27 = vmul.f32 %v1875_v48, %v5154_v13  ;;  %v1949_v39 = vadd.f32 0.0036580483, %v1948_v20  ;;  %v1960_v63 = vadd.f32 0.014752088, %v1959_v2  ;;  %2483 = vmatpush.bf16.msrb.mxu0 %v4270_v7  ;;  %v4269_v20 = vld [vmem:[%s5818_s5 + $0x80] sm:$0xff]  ;;  %v4279_v2 = vld [vmem:[%s5818_s5 + $0xd0] sm:$0xff] }
 0x20c   : > { %v1850_v31 = vmul.f32 %v4371_v14, %v1849_v18  ;;  %v1913_v35 = vadd.f32 0.18741608, %v1912_v30  ;;  %vm1892_vm6 = vweird.f32 %v5289_v5  ;;  %v5321_v52 = vmul.f32 0.70710677, %v5299_v37 }
 0x20d   : > { %v1924_v60 = vadd.f32 0.4994258, %v1923_v36  ;;  %v1565_v13 = vadd.f32 %v1552_v55, %v5236_v56  ;;  %v1896_v32 = vand.u32 2147483647, %v5289_v5  ;;  %v1950_v46 = vmul.f32 %v1949_v39, %v5270_v23 }
 0x20e   : > { %v1851_v21 = vadd.f32 %v4371_v14, %v1850_v31  ;;  %v1961_v16 = vmul.f32 %v1960_v63, %v5270_v23  ;;  %v1555_v56 = vpop.f32.mrf.mxu3  ;;  %v1898_v45 = vand.u32 2147483648, %v5289_v5  ;;  %v1914_v58 = vmul.f32 %v1913_v35, %v5207_v44  ;;  %v4253_v31 = vld [vmem:[%s5818_s5] sm:$0xff] }
 0x20f   : > { %v1951_v0 = vadd.f32 0.05243302, %v1950_v46  ;;  %v1984_v6 = vmul.f32 %v5321_v52, %v5321_v52  ;;  %v1679_v43 = vadd.f32 %v1666_v38, %v1565_v13  ;;  %v1566_v8 = vadd.f32 %v1555_v56, %v5256_v1  ;;  %v1669_v38 = vpop.f32.mrf.mxu0  ;;  %2378 = vmatpush.bf16.msrb.mxu3 %v4253_v31  ;;  %2484 = vmatpush.bf16.msrb.mxu0 %v4269_v20  ;;  %v1783_v46 = vpop.f32.mrf.mxu1 }
 0x210   : > { %v5330_v9 = vpop.eup %4372  ;;  %v1855_v4 = vsel %vm5315_vm5, %v4371_v14, %v1851_v21  ;;  %v1925_v14 = vmul.f32 %v1924_v60, %v5207_v44  ;;  %v1962_v3 = vadd.f32 0.112945676, %v1961_v16  ;;  %v4280_v44 = vld [vmem:[%s5818_s5 + $0xd8] sm:$0xff]  ;;  %vm5365_vm8 = vcmp.eq.f32.partialorder %v1896_v32, 8.507059e+37 }
 0x211   : > { %v1860_v33 = vsel %vm5301_vm4, %v1859_v61, %v1855_v4  ;;  %v1888_v54 = vmul.f32 %v5330_v9, %v5289_v5  ;;  %v1952_v62 = vmul.f32 %v1951_v0, %v5270_v23  ;;  %vm1893_vm7 = vweird.f32 %v5330_v9  ;;  %2595 = vmatpush.bf16.msrb.mxu1 %v4280_v44  ;;  %v4277_v0 = vld [vmem:[%s5818_s5 + $0xc0] sm:$0xff] }
 0x212   : > { %v1861_v55 = vmul.f32 %v1860_v33, %v1836_v29  ;;  %v5359_v17 = vadd.f32 1.0, %v1925_v14  ;;  %v1963_v59 = vmul.f32 %v1962_v3, %v5270_v23  ;;  %v5369_v1 = vmin.f32 %v1984_v6, 16.0  ;;  %vm1894_vm9 = vmor %vm1892_vm6, %vm1893_vm7  ;;  %v2217_v44 = vld [vmem:[#allocation3 + $0x1] sm:$0xff] }
 0x213   : > { %v1889_v11 = vsub.f32 1.0, %v1888_v54  ;;  %v1899_v30 = vor.u32 1.1754944e-38, %v1898_v45  ;;  %v1793_v53 = vadd.f32 %v1780_v51, %v1679_v43  ;;  %v1915_v61 = vadd.f32 1.1283791, %v1914_v58 }
 0x214   : > { %v3747_v19 = vclamps-f32 %v1861_v55, 1.0  ;;  %4374 = vrcp.f32 %v5359_v17  ;;  %v1953_v35 = vadd.f32 0.18741608, %v1952_v62  ;;  %v1964_v36 = vadd.f32 0.4994258, %v1963_v59 }
 0x215   : > { %v1890_v29 = vmul.f32 %v5330_v9, %v1889_v11  ;;  %v1986_v39 = vmul.f32 2.1237322e-06, %v5369_v1  ;;  %v1997_v63 = vmul.f32 3.8918573e-05, %v5369_v1  ;;  %v1680_v26 = vadd.f32 %v1669_v38, %v1566_v8  ;;  %2596 = vmatpush.bf16.msrb.mxu1 %v4279_v2 }
 0x216   : > { %v2144_v48 = vadd.f32 1.0, %v3747_v19  ;;  %v1936_v60 = vand.u32 2147483647, %v5359_v17  ;;  %v1954_v13 = vmul.f32 %v1953_v35, %v5270_v23  ;;  %v5399_v4 = vadd.f32 %v5123_v40, %v1793_v53  ;;  %v1557_v8 = vpop.f32.mrf.mxu3 }
 0x217   : > { %v1891_v24 = vadd.f32 %v5330_v9, %v1890_v29  ;;  %v1987_v57 = vadd.f32 0.00028619796, %v1986_v39  ;;  %v1998_v25 = vadd.f32 0.001143296, %v1997_v63  ;;  %v1809_v32 = vmul.f32 0.5, %v5145_v12 }
 0x218   : > { %v5383_v21 = vmul.f32 %v2144_v48, %v5262_v50  ;;  %v1965_v50 = vmul.f32 %v1964_v36, %v5270_v23  ;;  %v5407_v16 = vmul.f32 0.5, %v5178_v22  ;;  %v5414_v54 = vmul.f32 0.70710677, %v5399_v4 }
 0x219   : > { %v1895_v47 = vsel %vm1894_vm9, %v5330_v9, %v1891_v24  ;;  %v4278_v9 = vld [vmem:[%s5818_s5 + $0xc8] sm:$0xff]  ;;  %v1988_v33 = vmul.f32 %v1987_v57, %v5369_v1  ;;  %v1999_v51 = vmul.f32 %v1998_v25, %v5369_v1  ;;  %v1794_v45 = vadd.f32 %v1783_v46, %v1680_v26 }
 0x21a   : > { %2181 = vst [vmem:[#allocation3 + $0x11] sm:$0xff] %v5383_v21  ;;  %v1900_v5 = vsel %vm5365_vm8, %v1899_v30, %v1895_v47  ;;  %v5409_v56 = vadd.f32 1.0, %v1965_v50  ;;  %v4375_v41 = vpop.eup %4374  ;;  %v1916_v12 = vmul.f32 %v1915_v61, %v5186_v34  ;;  %vm1932_vm10 = vweird.f32 %v5359_v17  ;;  %2597 = vmatpush.bf16.msrb.mxu1 %v4278_v9 }
 0x21b   : > { %v1901_v23 = vmul.f32 %v1900_v5, %v5307_v27  ;;  %v1928_v27 = vmul.f32 %v4375_v41, %v5359_v17  ;;  %vm5419_vm11 = vcmp.eq.f32.partialorder %v1936_v60, 8.507059e+37  ;;  %v1938_v55 = vand.u32 2147483648, %v5359_v17  ;;  %v1671_v17 = vpop.f32.mrf.mxu0 }
 0x21c   : > { %v1955_v14 = vadd.f32 1.1283791, %v1954_v13  ;;  %4376 = vrcp.f32 %v5409_v56  ;;  %v1989_v49 = vadd.f32 0.0036580483, %v1988_v33  ;;  %v2000_v7 = vadd.f32 0.014752088, %v1999_v51 }
 0x21d   : > { %v3748_v58 = vclamps-f32 %v1901_v23, 1.0  ;;  %v1929_v34 = vsub.f32 1.0, %v1928_v27  ;;  %vm1933_vm12 = vweird.f32 %v4375_v41  ;;  %v1976_v11 = vand.u32 2147483647, %v5409_v56 }
 0x21e   : > { %v2024_v6 = vmul.f32 %v5414_v54, %v5414_v54  ;;  %v5432_v43 = vadd.f32 %v5123_v40, %v1794_v45  ;;  %v1990_v59 = vmul.f32 %v1989_v49, %v5369_v1  ;;  %v2001_v29 = vmul.f32 %v2000_v7, %v5369_v1  ;;  %2598 = vmatpush.bf16.msrb.mxu1 %v4277_v0  ;;  %vm1934_vm14 = vmor %vm1932_vm10, %vm1933_vm12 }
 0x21f   : > { %v2145_v3 = vadd.f32 1.0, %v3748_v58  ;;  %v1930_v62 = vmul.f32 %v4375_v41, %v1929_v34  ;;  %v1939_v18 = vor.u32 1.1754944e-38, %v1938_v55  ;;  %v1956_v48 = vmul.f32 %v1955_v14, %v5233_v28  ;;  %v1785_v55 = vpop.f32.mrf.mxu1 }
 0x220   : > { %v5439_v30 = vmin.f32 %v2024_v6, 16.0  ;;  %v5442_v53 = vmul.f32 0.70710677, %v5432_v43  ;;  %vm1972_vm13 = vweird.f32 %v5409_v56  ;;  %v2002_v20 = vadd.f32 0.112945676, %v2001_v29 }
 0x221   : > { %v5434_v19 = vmul.f32 %v2145_v3, %v1809_v32  ;;  %v1931_v31 = vadd.f32 %v4375_v41, %v1930_v62  ;;  %v1567_v2 = vadd.f32 %v1557_v8, %v5267_v42  ;;  %v2225_v38 = vpack.c.bf16 %v5383_v21, %v2217_v44 }
 0x222   : > { %v4377_v24 = vpop.eup %4376  ;;  %v1978_v28 = vand.u32 2147483648, %v5409_v56  ;;  %v2026_v61 = vmul.f32 2.1237322e-06, %v5439_v30  ;;  %v2037_v35 = vmul.f32 3.8918573e-05, %v5439_v30  ;;  %v2064_v36 = vmul.f32 %v5442_v53, %v5442_v53 }
 0x223   : > { %2182 = vst [vmem:[#allocation3 + $0x21] sm:$0xff] %v5434_v19  ;;  %v1935_v39 = vsel %vm1934_vm14, %v4375_v41, %v1931_v31  ;;  %v1968_v63 = vmul.f32 %v4377_v24, %v5409_v56  ;;  %vm5457_vm15 = vcmp.eq.f32.partialorder %v1976_v11, 8.507059e+37  ;;  %v1991_v21 = vadd.f32 0.05243302, %v1990_v59  ;;  %2302 = vmatmul.bf16.vlgmr.msra.gmra.mxu2 %v2225_v38 }
 0x224   : > { %v1940_v26 = vsel %vm5419_vm11, %v1939_v18, %v1935_v39  ;;  %v2003_v47 = vmul.f32 %v2002_v20, %v5369_v1  ;;  %v2027_v60 = vadd.f32 0.00028619796, %v2026_v61  ;;  %v2038_v13 = vadd.f32 0.001143296, %v2037_v35  ;;  %v2400_v61 = vld [vmem:[#allocation3 + $0x2] sm:$0xff]  ;;  %v5490_v35 = vld [vmem:[#allocation3 + $0x12] sm:$0xff] }
 0x225   : > { %v1941_v50 = vmul.f32 %v1940_v26, %v1916_v12  ;;  %v1969_v5 = vsub.f32 1.0, %v1968_v63  ;;  %v5464_v57 = vmin.f32 %v2064_v36, 16.0  ;;  %v1681_v25 = vadd.f32 %v1671_v17, %v1567_v2 }
 0x226   : > { %vm1973_vm0 = vweird.f32 %v4377_v24  ;;  %v2004_v9 = vadd.f32 0.4994258, %v2003_v47  ;;  %v2028_v32 = vmul.f32 %v2027_v60, %v5439_v30  ;;  %v2039_v23 = vmul.f32 %v2038_v13, %v5439_v30 }
 0x227   : > { %v3749_v46 = vclamps-f32 %v1941_v50, 1.0  ;;  %v1970_v41 = vmul.f32 %v4377_v24, %v1969_v5  ;;  %v1992_v33 = vmul.f32 %v1991_v21, %v5369_v1  ;;  %v2066_v51 = vmul.f32 2.1237322e-06, %v5464_v57  ;;  %vm1974_vm1 = vmor %vm1972_vm13, %vm1973_vm0 }
 0x228   : > { %v2005_v45 = vmul.f32 %v2004_v9, %v5369_v1  ;;  %v2029_v58 = vadd.f32 0.0036580483, %v2028_v32  ;;  %v2040_v12 = vadd.f32 0.014752088, %v2039_v23  ;;  %v2077_v27 = vmul.f32 3.8918573e-05, %v5464_v57 }
 0x229   : > { %v2146_v22 = vadd.f32 1.0, %v3749_v46  ;;  %v1971_v14 = vadd.f32 %v4377_v24, %v1970_v41  ;;  %v1979_v0 = vor.u32 1.1754944e-38, %v1978_v28  ;;  %v2067_v3 = vadd.f32 0.00028619796, %v2066_v51  ;;  %v4291_v23 = vld [vmem:[%s5818_s5 + $0x130] sm:$0xff] }
 0x22a   : > { %v5475_v34 = vadd.f32 1.0, %v2005_v45  ;;  %v2041_v49 = vmul.f32 %v2040_v12, %v5439_v30  ;;  %v2078_v7 = vadd.f32 0.001143296, %v2077_v27  ;;  %v1795_v11 = vadd.f32 %v1785_v55, %v1681_v25  ;;  %v2515_v60 = vld [vmem:[#allocation3 + $0x20] sm:$0xff] }
 0x22b   : > { %v2154_v6 = vmul.f32 %v2146_v22, %v5407_v16  ;;  %v1975_v8 = vsel %vm1974_vm1, %v4377_v24, %v1971_v14  ;;  %v1993_v44 = vadd.f32 0.18741608, %v1992_v33  ;;  %v2030_v62 = vmul.f32 %v2029_v58, %v5439_v30  ;;  %v2190_v16 = vld [vmem:[#allocation3 + $0x10] sm:$0xff] }
 0x22c   : > { %v1980_v59 = vsel %vm5457_vm15, %v1979_v0, %v1975_v8  ;;  %4378 = vrcp.f32 %v5475_v34  ;;  %v2042_v29 = vadd.f32 0.112945676, %v2041_v49  ;;  %v2068_v18 = vmul.f32 %v2067_v3, %v5464_v57  ;;  %v4290_v0 = vld [vmem:[%s5818_s5 + $0x128] sm:$0xff]  ;;  %v4300_v3 = vld [vmem:[%s5818_s5 + $0x178] sm:$0xff] }
 0x22d   : > { %2183 = vst [vmem:[#allocation3 + $0x31] sm:$0xff] %v2154_v6  ;;  %v1981_v56 = vmul.f32 %v1980_v59, %v1956_v48  ;;  %v2079_v31 = vmul.f32 %v2078_v7, %v5464_v57  ;;  %v5486_v20 = vadd.f32 %v5123_v40, %v1795_v11  ;;  %v1994_v38 = vmul.f32 %v1993_v44, %v5369_v1  ;;  %v4292_v40 = vld [vmem:[%s5818_s5 + $0x138] sm:$0xff] }
 0x22e   : > { %v2031_v24 = vadd.f32 0.05243302, %v2030_v62  ;;  %v2043_v28 = vmul.f32 %v2042_v29, %v5439_v30  ;;  %v1811_v48 = vmul.f32 0.5, %v5217_v15  ;;  %v2069_v21 = vadd.f32 0.0036580483, %v2068_v18  ;;  %2705 = vmatpush.bf16.msrb.mxu2 %v4292_v40  ;;  %v4308_v49 = vld [vmem:[%s5818_s5 + $0x1b8] sm:$0xff]  ;;  %2819 = vmatpush.bf16.msra.mxu3 %v4300_v3 }
 0x22f   : > { %v3750_v2 = vclamps-f32 %v1981_v56, 1.0  ;;  %v2080_v36 = vadd.f32 0.014752088, %v2079_v31  ;;  %v5494_v39 = vmul.f32 0.70710677, %v5486_v20  ;;  %v2197_v1 = vpack.c.bf16 %v2190_v16, %v5088_v10  ;;  %2934 = vmatpush.bf16.msra.mxu0 %v4308_v49 }
 0x230   : > { %v2044_v42 = vadd.f32 0.4994258, %v2043_v28  ;;  %v2408_v15 = vpack.c.bf16 %v5490_v35, %v2400_v61  ;;  %v1995_v50 = vadd.f32 1.1283791, %v1994_v38  ;;  %v2032_v25 = vmul.f32 %v2031_v24, %v5439_v30 }
 0x231   : > { %v2147_v63 = vadd.f32 1.0, %v3750_v2  ;;  %v2081_v26 = vmul.f32 %v2080_v36, %v5464_v57  ;;  %v2104_v47 = vmul.f32 %v5494_v39, %v5494_v39  ;;  %2379 = vmatmul.bf16.vlgmr.msrb.gmra.mxu3 %v2197_v1  ;;  %v2070_v41 = vmul.f32 %v2069_v21, %v5464_v57  ;;  %v4289_v2 = vld [vmem:[%s5818_s5 + $0x120] sm:$0xff] }
 0x232   : > { %v4379_v17 = vpop.eup %4378  ;;  %v2045_v10 = vmul.f32 %v2044_v42, %v5439_v30  ;;  %2485 = vmatmul.bf16.vlgmr.msrb.gmra.mxu0 %v2408_v15  ;;  %v2522_v33 = vpack.c.bf16 %v2515_v60, %v2190_v16  ;;  %v2226_v51 = vpack.c.bf16 %v2154_v6, %v5434_v19  ;;  %v2018_v45 = vand.u32 2147483648, %v5475_v34  ;;  %2706 = vmatpush.bf16.msrb.mxu2 %v4291_v23 }
 0x233   : > { %v5504_v13 = vmul.f32 %v2147_v63, %v1811_v48  ;;  %v2008_v5 = vmul.f32 %v4379_v17, %v5475_v34  ;;  %v2082_v9 = vadd.f32 0.112945676, %v2081_v26  ;;  %v5509_v32 = vmin.f32 %v2104_v47, 16.0  ;;  %v4299_v48 = vld [vmem:[%s5818_s5 + $0x170] sm:$0xff] }
 0x234   : > { %v5518_v58 = vadd.f32 1.0, %v2045_v10  ;;  %vm2013_vm2 = vweird.f32 %v4379_v17  ;;  %v2016_v55 = vand.u32 2147483647, %v5475_v34  ;;  %2599 = vmatmul.bf16.vlgmr.msrb.gmra.mxu1 %v2522_v33  ;;  %2307 = vmatmul.bf16.gmra.mxu2 %v2226_v51  ;;  %vm2012_vm3 = vweird.f32 %v5475_v34  ;;  %v5539_v18 = vld [vmem:[#allocation3 + $0x30] sm:$0xff] }
 0x235   : > { %2184 = vst [vmem:[#allocation3 + $0x41] sm:$0xff] %v5504_v13  ;;  %v2009_v46 = vsub.f32 1.0, %v2008_v5  ;;  %v2083_v12 = vmul.f32 %v2082_v9, %v5464_v57  ;;  %v2106_v27 = vmul.f32 2.1237322e-06, %v5509_v32  ;;  %v2117_v14 = vmul.f32 3.8918573e-05, %v5509_v32  ;;  %vm2014_vm4 = vmor %vm2012_vm3, %vm2013_vm2  ;;  %2820 = vmatpush.bf16.msra.mxu3 %v4299_v48 }
 0x236   : > { %v2033_v19 = vadd.f32 0.18741608, %v2032_v25  ;;  %4380 = vrcp.f32 %v5518_v58  ;;  %v2071_v11 = vadd.f32 0.05243302, %v2070_v41  ;;  %v1996_v34 = vmul.f32 %v1995_v50, %v5321_v52  ;;  %2707 = vmatpush.bf16.msrb.mxu2 %v4290_v0  ;;  %v5549_v61 = vld [vmem:[#allocation3 + $0x32] sm:$0xff] }
 0x237   : > { %v2010_v22 = vmul.f32 %v4379_v17, %v2009_v46  ;;  %v2084_v6 = vadd.f32 0.4994258, %v2083_v12  ;;  %v2107_v8 = vadd.f32 0.00028619796, %v2106_v27  ;;  %v2019_v44 = vor.u32 1.1754944e-38, %v2018_v45  ;;  %v4288_v50 = vld [vmem:[%s5818_s5 + $0x118] sm:$0xff] }
 0x238   : > { %v2118_v62 = vadd.f32 0.001143296, %v2117_v14  ;;  %vm2017_vm5 = vcmp.eq.f32.partialorder %v2016_v55, 8.507059e+37  ;;  %v2034_v16 = vmul.f32 %v2033_v19, %v5439_v30  ;;  %v2072_v24 = vmul.f32 %v2071_v11, %v5464_v57  ;;  %v4307_v30 = vld [vmem:[%s5818_s5 + $0x1b0] sm:$0xff]  ;;  %v4316_v5 = vld [vmem:[%s5818_s5 + $0x1f8] sm:$0xff]  ;;  %v4306_v46 = vld [vmem:[%s5818_s5 + $0x1a8] sm:$0xff] }
 0x239   : > { %v2011_v7 = vadd.f32 %v4379_v17, %v2010_v22  ;;  %v2085_v56 = vmul.f32 %v2084_v6, %v5464_v57  ;;  %v2108_v29 = vmul.f32 %v2107_v8, %v5509_v32  ;;  %v5558_v63 = vpack.c.bf16 %v5539_v18, %v2515_v60  ;;  %2935 = vmatpush.bf16.msra.mxu0 %v4307_v30  ;;  %v4287_v55 = vld [vmem:[%s5818_s5 + $0x110] sm:$0xff]  ;;  %v4297_v14 = vld [vmem:[%s5818_s5 + $0x160] sm:$0xff] }
 0x23a   : > { %v2119_v52 = vmul.f32 %v2118_v62, %v5509_v32  ;;  %2708 = vmatpush.bf16.msrb.mxu2 %v4289_v2  ;;  %v1812_v47 = vmul.f32 0.5, %v5299_v37  ;;  %v2035_v15 = vadd.f32 1.1283791, %v2034_v16  ;;  %v2073_v9 = vadd.f32 0.18741608, %v2072_v24  ;;  %v4298_v37 = vld [vmem:[%s5818_s5 + $0x168] sm:$0xff]  ;;  %3048 = vmatpush.bf16.msra.mxu1 %v4316_v5 }
 0x23b   : > { %v2015_v59 = vsel %vm2014_vm4, %v4379_v17, %v2011_v7  ;;  %v5547_v28 = vadd.f32 1.0, %v2085_v56  ;;  %v2109_v1 = vadd.f32 0.0036580483, %v2108_v29  ;;  %v5562_v17 = vld [vmem:[#allocation3 + $0x22] sm:$0xff]  ;;  %v2056_v41 = vand.u32 2147483647, %v5518_v58  ;;  %2821 = vmatpush.bf16.msra.mxu3 %v4298_v37 }
 0x23c   : > { %v2020_v31 = vsel %vm2017_vm5, %v2019_v44, %v2015_v59  ;;  %v4381_v36 = vpop.eup %4380  ;;  %v2120_v40 = vadd.f32 0.014752088, %v2119_v52  ;;  %v5564_v26 = vld [vmem:[#allocation3 + $0x40] sm:$0xff]  ;;  %v5569_v60 = vpack.c.bf16 %v5549_v61, %v5562_v17  ;;  %v2058_v33 = vand.u32 2147483648, %v5518_v58  ;;  %v4315_v11 = vld [vmem:[%s5818_s5 + $0x1f0] sm:$0xff]  ;;  %v4304_v29 = vld [vmem:[%s5818_s5 + $0x198] sm:$0xff] }
 0x23d   : > { %v2021_v38 = vmul.f32 %v2020_v31, %v1996_v34  ;;  %v2048_v21 = vmul.f32 %v4381_v36, %v5518_v58  ;;  %4382 = vrcp.f32 %v5547_v28  ;;  %vm2053_vm6 = vweird.f32 %v4381_v36  ;;  %2936 = vmatpush.bf16.msra.mxu0 %v4306_v46  ;;  %v4305_v19 = vld [vmem:[%s5818_s5 + $0x1a0] sm:$0xff]  ;;  %v4314_v52 = vld [vmem:[%s5818_s5 + $0x1e8] sm:$0xff] }
 0x23e   : > { %v2121_v23 = vmul.f32 %v2120_v40, %v5509_v32  ;;  %v2523_v51 = vpack.c.bf16 %v5564_v26, %v5539_v18  ;;  %2709 = vmatpush.bf16.msrb.mxu2 %v4288_v50  ;;  %v2110_v27 = vmul.f32 %v2109_v1, %v5509_v32  ;;  %vm2052_vm7 = vweird.f32 %v5518_v58  ;;  %v4286_v58 = vld [vmem:[%s5818_s5 + $0x108] sm:$0xff]  ;;  %3049 = vmatpush.bf16.msra.mxu1 %v4315_v11  ;;  %v4295_v40 = vld [vmem:[%s5818_s5 + $0x150] sm:$0xff] }
 0x23f   : > { %v3751_v42 = vclamps-f32 %v2021_v38, 1.0  ;;  %v2049_v10 = vsub.f32 1.0, %v2048_v21  ;;  %v2036_v6 = vmul.f32 %v2035_v15, %v5414_v54  ;;  %vm2054_vm8 = vmor %vm2052_vm7, %vm2053_vm6  ;;  %v2059_v8 = vor.u32 1.1754944e-38, %v2058_v33  ;;  %2822 = vmatpush.bf16.msra.mxu3 %v4297_v14  ;;  %v4303_v1 = vld [vmem:[%s5818_s5 + $0x190] sm:$0xff] }
 0x240   : > { %v2122_v22 = vadd.f32 0.112945676, %v2121_v23  ;;  %v2074_v34 = vmul.f32 %v2073_v9, %v5464_v57  ;;  %vm2057_vm9 = vcmp.eq.f32.partialorder %v2056_v41, 8.507059e+37  ;;  %v4296_v57 = vld [vmem:[%s5818_s5 + $0x158] sm:$0xff]  ;;  %v2098_v31 = vand.u32 2147483648, %v5547_v28  ;;  %v5659_v41 = vld [vmem:[#allocation3 + $0x42] sm:$0xff] }
 0x241   : > { %v2148_v25 = vadd.f32 1.0, %v3751_v42  ;;  %v2050_v12 = vmul.f32 %v4381_v36, %v2049_v10  ;;  %2384 = vmatmul.bf16.gmra.mxu3 %v5558_v63  ;;  %2937 = vmatpush.bf16.msra.mxu0 %v4305_v19  ;;  %v2096_v24 = vand.u32 2147483647, %v5547_v28  ;;  %vm2092_vm11 = vweird.f32 %v5547_v28 }
 0x242   : > { %2490 = vmatmul.bf16.gmra.mxu0 %v5569_v60  ;;  %v2123_v49 = vmul.f32 %v2122_v22, %v5509_v32  ;;  %2710 = vmatpush.bf16.msrb.mxu2 %v4287_v55  ;;  %v2075_v2 = vadd.f32 1.1283791, %v2074_v34  ;;  %v1813_v15 = vmul.f32 0.5, %v5399_v4  ;;  %v2099_v5 = vor.u32 1.1754944e-38, %v2098_v31  ;;  %v4309_v31 = vld [vmem:[%s5818_s5 + $0x1c0] sm:$0xff] }
 0x243   : > { %v5588_v45 = vmul.f32 %v2148_v25, %v1812_v47  ;;  %v4383_v0 = vpop.eup %4382  ;;  %v2051_v3 = vadd.f32 %v4381_v36, %v2050_v12  ;;  %2823 = vmatpush.bf16.msra.mxu3 %v4296_v57  ;;  %v4285_v47 = vld [vmem:[%s5818_s5 + $0x100] sm:$0xff]  ;;  %3050 = vmatpush.bf16.msra.mxu1 %v4314_v52  ;;  %vm2097_vm13 = vcmp.eq.f32.partialorder %v2096_v24, 8.507059e+37  ;;  %v4312_v12 = vld [vmem:[%s5818_s5 + $0x1d8] sm:$0xff]  ;;  %v1814_v14 = vmul.f32 0.5, %v5432_v43 }
 0x244   : > { %v2088_v44 = vmul.f32 %v4383_v0, %v5547_v28  ;;  %v2124_v59 = vadd.f32 0.4994258, %v2123_v49  ;;  %2604 = vmatmul.bf16.gmra.mxu1 %v2523_v51  ;;  %vm2093_vm10 = vweird.f32 %v4383_v0  ;;  %v4313_v25 = vld [vmem:[%s5818_s5 + $0x1e0] sm:$0xff]  ;;  %v2076_v10 = vmul.f32 %v2075_v2, %v5442_v53  ;;  %v4294_v53 = vld [vmem:[%s5818_s5 + $0x148] sm:$0xff]  ;;  %v4324_v49 = vld [vmem:[%s5818_s5 + $0x238] sm:$0xff] }
 0x245   : > { %2185 = vst [vmem:[#allocation3 + $0x51] sm:$0xff] %v5588_v45  ;;  %v2227_v7 = vpack.c.bf16 %v5588_v45, %v5504_v13  ;;  %v2055_v62 = vsel %vm2054_vm8, %v4381_v36, %v2051_v3  ;;  %v2111_v13 = vadd.f32 0.05243302, %v2110_v27  ;;  %2938 = vmatpush.bf16.msra.mxu0 %v4304_v29  ;;  %vm2094_vm12 = vmor %vm2092_vm11, %vm2093_vm10  ;;  %v4293_v3 = vld [vmem:[%s5818_s5 + $0x140] sm:$0xff] }
 0x246   : > { %v2060_v56 = vsel %vm2057_vm9, %v2059_v8, %v2055_v62  ;;  %v2089_v54 = vsub.f32 1.0, %v2088_v44  ;;  %v2125_v16 = vmul.f32 %v2124_v59, %v5509_v32  ;;  %2711 = vmatpush.bf16.msrb.mxu2 %v4286_v58  ;;  %v4301_v43 = vld [vmem:[%s5818_s5 + $0x180] sm:$0xff]  ;;  %v4310_v59 = vld [vmem:[%s5818_s5 + $0x1c8] sm:$0xff] }
 0x247   : > { %2312 = vmatmul.bf16.gmra.mxu2 %v2227_v7  ;;  %v2061_v18 = vmul.f32 %v2060_v56, %v2036_v6  ;;  %v2112_v30 = vmul.f32 %v2111_v13, %v5509_v32  ;;  %2824 = vmatpush.bf16.msra.mxu3 %v4295_v40 }
 0x248   : > { %v2090_v38 = vmul.f32 %v4383_v0, %v2089_v54  ;;  %v5630_v36 = vadd.f32 1.0, %v2125_v16  ;;  %3051 = vmatpush.bf16.msra.mxu1 %v4313_v25  ;;  %v2750_v25 = vpack.c.bf16 %v5562_v17, %v5490_v35  ;;  %v4319_v35 = vld [vmem:[%s5818_s5 + $0x210] sm:$0xff]  ;;  %v2751_v17 = vpack.c.bf16 %v5659_v41, %v5549_v61 }
 0x249   : > { %v3752_v48 = vclamps-f32 %v2061_v18, 1.0  ;;  %v2113_v37 = vadd.f32 0.18741608, %v2112_v30  ;;  %2939 = vmatpush.bf16.msra.mxu0 %v4303_v1  ;;  %v2629_v1 = vld [vmem:[#allocation3 + $0x21] sm:$0xff] }
 0x24a   : > { %v2091_v42 = vadd.f32 %v4383_v0, %v2090_v38  ;;  %4384 = vrcp.f32 %v5630_v36  ;;  %2712 = vmatpush.bf16.msrb.mxu2 %v4285_v47  ;;  %v2138_v8 = vand.u32 2147483648, %v5630_v36  ;;  %v2136_v44 = vand.u32 2147483647, %v5630_v36  ;;  %v2628_v47 = vld [vmem:[#allocation3 + $0x11] sm:$0xff] }
 0x24b   : > { %v2149_v50 = vadd.f32 1.0, %v3752_v48  ;;  %v2114_v55 = vmul.f32 %v2113_v37, %v5509_v32  ;;  %2825 = vmatpush.bf16.msra.mxu3 %v4294_v53  ;;  %v4311_v32 = vld [vmem:[%s5818_s5 + $0x1d0] sm:$0xff]  ;;  %vm2132_vm15 = vweird.f32 %v5630_v36 }
 0x24c   : > { %v5636_v21 = vld [vmem:[#allocation3 + $0x50] sm:$0xff]  ;;  %v2095_v9 = vsel %vm2094_vm12, %v4383_v0, %v2091_v42  ;;  %3052 = vmatpush.bf16.msra.mxu1 %v4312_v12  ;;  %v2139_v54 = vor.u32 1.1754944e-38, %v2138_v8  ;;  %vm2137_vm1 = vcmp.eq.f32.partialorder %v2136_v44, 8.507059e+37 }
 0x24d   : > { %v5647_v28 = vld [vmem:[#allocation3 + $0x52] sm:$0xff]  ;;  %v5653_v23 = vmul.f32 %v2149_v50, %v1813_v15  ;;  %v2100_v4 = vsel %vm2097_vm13, %v2099_v5, %v2095_v9  ;;  %v5657_v46 = vpack.c.bf16 %v5636_v21, %v5564_v26  ;;  %v4302_v26 = vld [vmem:[%s5818_s5 + $0x188] sm:$0xff]  ;;  %v2115_v6 = vadd.f32 1.1283791, %v2114_v55  ;;  %v4321_v5 = vld [vmem:[%s5818_s5 + $0x220] sm:$0xff] }
 0x24e   : > { %v2101_v33 = vmul.f32 %v2100_v4, %v2076_v10  ;;  %v5663_v51 = vpack.c.bf16 %v5647_v28, %v5659_v41  ;;  %2940 = vmatpush.bf16.msra.mxu0 %v4302_v26  ;;  %4333 = vmatpush.bf16.msra.mxu2 %v4324_v49  ;;  %v2636_v15 = vpack.c.bf16 %v2629_v1, %v2628_v47  ;;  %v4320_v10 = vld [vmem:[%s5818_s5 + $0x218] sm:$0xff]  ;;  %v2631_v9 = vld [vmem:[#allocation3 + $0x41] sm:$0xff] }
 0x24f   : > { %2186 = vst [vmem:[#allocation3 + $0x61] sm:$0xff] %v5653_v23  ;;  %2826 = vmatpush.bf16.msra.mxu3 %v4293_v3  ;;  %v2116_v57 = vmul.f32 %v2115_v6, %v5494_v39  ;;  %v4323_v39 = vld [vmem:[%s5818_s5 + $0x230] sm:$0xff]  ;;  %v2638_v53 = vpack.c.bf16 %v5653_v23, %v5588_v45  ;;  %v4317_v26 = vld [vmem:[%s5818_s5 + $0x200] sm:$0xff]  ;;  %v2980_v61 = vpack.c.bf16 %v5588_v45, %v2631_v9 }
 0x250   : > { %v3753_v27 = vclamps-f32 %v2101_v33, 1.0  ;;  %v4385_v22 = vpop.eup %4384  ;;  %3053 = vmatpush.bf16.msra.mxu1 %v4311_v32  ;;  %v2972_v4 = vld [vmem:[#allocation3 + $0x31] sm:$0xff] }
 0x251   : > { %2389 = vmatmul.bf16.gmra.mxu3 %v5657_v46  ;;  %v2128_v0 = vmul.f32 %v4385_v22, %v5630_v36  ;;  %vm2133_vm14 = vweird.f32 %v4385_v22  ;;  %v1815_v36 = vmul.f32 0.5, %v5486_v20  ;;  %v2637_v37 = vpack.c.bf16 %v2631_v9, %v2972_v4  ;;  %v2978_v55 = vld [vmem:[#allocation3 + $0x91] sm:$0xff] }
 0x252   : > { %v2150_v19 = vadd.f32 1.0, %v3753_v27  ;;  %2495 = vmatmul.bf16.gmra.mxu0 %v5663_v51  ;;  %vm2134_vm0 = vmor %vm2132_vm15, %vm2133_vm14  ;;  %4334 = vmatpush.bf16.msra.mxu2 %v4323_v39  ;;  %v2979_v33 = vpack.c.bf16 %v2972_v4, %v2629_v1  ;;  %v4387_v27 = vld [vmem:[#allocation2] sm:$0xff] }
 0x253   : > { %v2129_v11 = vsub.f32 1.0, %v2128_v0  ;;  %2941 = vmatpush.bf16.msra.mxu0 %v4301_v43 }
 0x254   : > { %v5692_v7 = vmul.f32 %v2150_v19, %v1814_v14  ;;  %3054 = vmatpush.bf16.msra.mxu1 %v4310_v59  ;;  %v3092_v59 = vld [vmem:[#allocation3 + $0x92] sm:$0xff] }
 0x255   : > { %v2130_v34 = vmul.f32 %v4385_v22, %v2129_v11 }
 0x256   : > { %2187 = vst [vmem:[#allocation3 + $0x71] sm:$0xff] %v5692_v7  ;;  %v2519_v58 = vld [vmem:[#allocation3 + $0x60] sm:$0xff]  ;;  %v5699_v62 = vpack.c.bf16 %v5692_v7, %v5653_v23 }
 0x257   : > { %v2524_v13 = vpack.c.bf16 %v2519_v58, %v5636_v21  ;;  %v2131_v56 = vadd.f32 %v4385_v22, %v2130_v34  ;;  %v2406_v2 = vld [vmem:[#allocation3 + $0x62] sm:$0xff] }
 0x258   : > { %2317 = vmatmul.bf16.gmra.mxu2 %v5699_v62  ;;  %3055 = vmatpush.bf16.msra.mxu1 %v4309_v31  ;;  %v4322_v21 = vld [vmem:[%s5818_s5 + $0x228] sm:$0xff] }
 0x259   : > { %2609 = vmatmul.bf16.gmra.mxu1 %v2524_v13  ;;  %v2135_v29 = vsel %vm2134_vm0, %v4385_v22, %v2131_v56  ;;  %4335 = vmatpush.bf16.msra.mxu2 %v4322_v21 }
 0x25a   : > { %v2140_v18 = vsel %vm2137_vm1, %v2139_v54, %v2135_v29 }
 0x25b   : > { %v2141_v16 = vmul.f32 %v2140_v18, %v2116_v57 }
 0x25c   : > { %3162 = vmatpush.bf16.msrb.mxu1 %v4324_v49 }
 0x25d   : > { %v2196_v52 = vld [vmem:[#allocation3 + $0x70] sm:$0xff]  ;;  %v3754_v24 = vclamps-f32 %v2141_v16, 1.0  ;;  %4336 = vmatpush.bf16.msra.mxu2 %v4321_v5 }
 0x25e   : > { %v5711_v38 = vld [vmem:[#allocation3 + $0x72] sm:$0xff]  ;;  %v2200_v48 = vpack.c.bf16 %v2196_v52, %v2519_v58 }
 0x25f   : > { %v5714_v30 = vpack.c.bf16 %v5711_v38, %v2406_v2  ;;  %v2151_v40 = vadd.f32 1.0, %v3754_v24 }
 0x260   : > { %3163 = vmatpush.bf16.msrb.mxu1 %v4323_v39 }
 0x261   : > { %2394 = vmatmul.bf16.gmra.mxu3 %v2200_v48  ;;  %v2159_v42 = vmul.f32 %v2151_v40, %v1815_v36  ;;  %4337 = vmatpush.bf16.msra.mxu2 %v4320_v10 }
 0x262   : > { %2500 = vmatmul.bf16.gmra.mxu0 %v5714_v30 }
 0x263   : > { %2188 = vst [vmem:[#allocation3 + $0x81] sm:$0xff] %v2159_v42  ;;  %v2639_v41 = vpack.c.bf16 %v2159_v42, %v5692_v7  ;;  %v2982_v14 = vpack.c.bf16 %v2978_v55, %v2159_v42 }
 0x264   : > { %3164 = vmatpush.bf16.msrb.mxu1 %v4322_v21 }
 0x265   : > { %4338 = vmatpush.bf16.msra.mxu2 %v4319_v35 }
 0x268   : > { %2713 = vmatmul.bf16.vlgmr.msrb.gmra.mxu2 %v2636_v15  ;;  %3165 = vmatpush.bf16.msrb.mxu1 %v4321_v5 }
 0x26a   : > { %v2521_v20 = vld [vmem:[#allocation3 + $0x80] sm:$0xff] }
 0x26b   : > { %v2525_v50 = vpack.c.bf16 %v2521_v20, %v2196_v52  ;;  %v2749_v12 = vld [vmem:[#allocation3 + $0x82] sm:$0xff]  ;;  %v2868_v22 = vpack.c.bf16 %v4387_v27, %v2521_v20 }
 0x26c   : > { %3166 = vmatpush.bf16.msrb.mxu1 %v4320_v10  ;;  %v2753_v23 = vpack.c.bf16 %v2749_v12, %v5711_v38  ;;  %v3096_v57 = vpack.c.bf16 %v3092_v59, %v2749_v12 }
 0x26d   : > { %2614 = vmatmul.bf16.gmra.mxu1 %v2525_v50 }
 0x270   : > { %3167 = vmatpush.bf16.msrb.mxu1 %v4319_v35 }
 0x271   : > { %2827 = vmatmul.bf16.vlgmr.msra.gmra.mxu3 %v2750_v25 }
 0x272   : > { %2942 = vmatmul.bf16.vlgmr.msra.gmra.mxu0 %v5558_v63  ;;  %v4318_v63 = vld [vmem:[%s5818_s5 + $0x208] sm:$0xff] }
 0x273   : > { %4339 = vmatpush.bf16.msra.mxu2 %v4318_v63 }
 0x274   : > { %3168 = vmatpush.bf16.msrb.mxu1 %v4318_v63 }
 0x277   : > { %4340 = vmatpush.bf16.msra.mxu2 %v4317_v26 }
 0x278   : > { %2718 = vmatmul.bf16.gmra.mxu2 %v2637_v37  ;;  %3169 = vmatpush.bf16.msrb.mxu1 %v4317_v26 }
 0x27d   : > { %3056 = vmatmul.bf16.vlgmr.msra.gmra.mxu1 %v2979_v33 }
 0x281   : > { %2832 = vmatmul.bf16.gmra.mxu3 %v2751_v17 }
 0x282   : > { %2947 = vmatmul.bf16.gmra.mxu0 %v5657_v46  ;;  %v2752_v46 = vpack.c.bf16 %v2406_v2, %v5647_v28 }
 0x288   : > { %2723 = vmatmul.bf16.gmra.mxu2 %v2638_v53 }
 0x28d   : > { %3061 = vmatmul.bf16.gmra.mxu1 %v2980_v61 }
 0x291   : > { %2837 = vmatmul.bf16.gmra.mxu3 %v2752_v46 }
 0x292   : > { %2952 = vmatmul.bf16.gmra.mxu0 %v2200_v48 }
 0x298   : > { %2728 = vmatmul.bf16.gmra.mxu2 %v2639_v41 }
 0x29d   : > { %3066 = vmatmul.bf16.gmra.mxu1 %v5699_v62 }
 0x2a1   : > { %2842 = vmatmul.bf16.gmra.mxu3 %v2753_v23 }
 0x2a2   : > { %2957 = vmatmul.bf16.gmra.mxu0 %v2868_v22 }
 0x2a6   : > { %v2303_v45 = vpop.f32.mrf.mxu2 }
 0x2a8   : > { %3175 = vmatmul.bf16.vlgmr.msra.gmra.mxu2 %v5663_v51 }
 0x2ad   : > { %3071 = vmatmul.bf16.gmra.mxu1 %v2982_v14 }
 0x2ae   : > { %v2305_v28 = vpop.f32.mrf.mxu2 }
 0x2af   : > { %v2486_v19 = vpop.f32.mrf.mxu0 }
 0x2b1   : > { %v2600_v0 = vpop.f32.mrf.mxu1 }
 0x2b4   : > { %v2380_v3 = vpop.f32.mrf.mxu3 }
 0x2b5   : > { %v2381_v49 = vadd.f32 %v2380_v3, %v2303_v45 }
 0x2b7   : > { %v2488_v43 = vpop.f32.mrf.mxu0  ;;  %v2506_v32 = vadd.f32 %v2486_v19, %v2381_v49  ;;  %v2308_v7 = vpop.f32.mrf.mxu2 }
 0x2b8   : > { %3180 = vmatmul.bf16.gmra.mxu2 %v5714_v30 }
 0x2b9   : > { %v2620_v11 = vadd.f32 %v2600_v0, %v2506_v32  ;;  %v2602_v6 = vpop.f32.mrf.mxu1 }
 0x2bc   : > { %v2382_v8 = vpop.f32.mrf.mxu3 }
 0x2bd   : > { %v2383_v34 = vadd.f32 %v2382_v8, %v2305_v28  ;;  %3170 = vmatmul.bf16.vlgmr.msrb.gmra.mxu1 %v5569_v60 }
 0x2bf   : > { %v2491_v51 = vpop.f32.mrf.mxu0  ;;  %v2507_v44 = vadd.f32 %v2488_v43, %v2383_v34  ;;  %v2310_v58 = vpop.f32.mrf.mxu2 }
 0x2c1   : > { %v2621_v62 = vadd.f32 %v2602_v6, %v2507_v44  ;;  %v2605_v13 = vpop.f32.mrf.mxu1 }
 0x2c4   : > { %v2385_v56 = vpop.f32.mrf.mxu3 }
 0x2c5   : > { %v2386_v54 = vadd.f32 %v2385_v56, %v2308_v7 }
 0x2c7   : > { %v2493_v29 = vpop.f32.mrf.mxu0  ;;  %v2508_v18 = vadd.f32 %v2491_v51, %v2386_v54 }
 0x2c8   : > { %3185 = vmatmul.bf16.gmra.mxu2 %v3096_v57 }
 0x2c9   : > { %v2622_v16 = vadd.f32 %v2605_v13, %v2508_v18  ;;  %v2607_v2 = vpop.f32.mrf.mxu1 }
 0x2ca   : > { %v2313_v31 = vpop.f32.mrf.mxu2 }
 0x2cc   : > { %v2387_v52 = vpop.f32.mrf.mxu3 }
 0x2cd   : > { %v2388_v38 = vadd.f32 %v2387_v52, %v2310_v58  ;;  %v5768_v52 = vld [vmem:[%s5819_s6] ss:$0 sm:$0xff] }
 0x2cf   : > { %v2509_v24 = vadd.f32 %v2493_v29, %v2388_v38  ;;  %v2496_v48 = vpop.f32.mrf.mxu0 }
 0x2d1   : > { %v2623_v60 = vadd.f32 %v2607_v2, %v2509_v24 }
 0x2d2   : > { %v2315_v30 = vpop.f32.mrf.mxu2 }
 0x2d4   : > { %v2390_v39 = vpop.f32.mrf.mxu3 }
 0x2d5   : > { %v2391_v36 = vadd.f32 %v2390_v39, %v2313_v31 }
 0x2d6   : > { %v2610_v40 = vpop.f32.mrf.mxu1 }
 0x2d7   : > { %v2510_v42 = vadd.f32 %v2496_v48, %v2391_v36  ;;  %v2498_v1 = vpop.f32.mrf.mxu0 }
 0x2d9   : > { %v2624_v21 = vadd.f32 %v2610_v40, %v2510_v42 }
 0x2db   : > { %v2318_v47 = vpop.f32.mrf.mxu2 }
 0x2dc   : > { %v2392_v15 = vpop.f32.mrf.mxu3 }
 0x2dd   : > { %v2393_v20 = vadd.f32 %v2392_v15, %v2315_v30 }
 0x2de   : > { %v2612_v5 = vpop.f32.mrf.mxu1 }
 0x2df   : > { %v2511_v50 = vadd.f32 %v2498_v1, %v2393_v20  ;;  %v2501_v4 = vpop.f32.mrf.mxu0 }
 0x2e1   : > { %v5755_v25 = vadd.f32 %v2612_v5, %v2511_v50 }
 0x2e3   : > { %v2320_v10 = vpop.f32.mrf.mxu2 }
 0x2e4   : > { %v2395_v9 = vpop.f32.mrf.mxu3 }
 0x2e5   : > { %v2396_v37 = vadd.f32 %v2395_v9, %v2318_v47 }
 0x2e7   : > { %v2512_v33 = vadd.f32 %v2501_v4, %v2396_v37  ;;  %v2503_v46 = vpop.f32.mrf.mxu0 }
 0x2ea   : > { %v2615_v35 = vpop.f32.mrf.mxu1 }
 0x2eb   : > { %v2714_v17 = vpop.f32.mrf.mxu2  ;;  %v5757_v63 = vadd.f32 %v2615_v35, %v2512_v33 }
 0x2ec   : > { %v2397_v53 = vpop.f32.mrf.mxu3  ;;  %v2734_v26 = vadd.f32 %v2714_v17, %v2620_v11 }
 0x2ed   : > { %v2398_v61 = vadd.f32 %v2397_v53, %v2320_v10 }
 0x2ef   : > { %v2513_v41 = vadd.f32 %v2503_v46, %v2398_v61  ;;  %v2943_v0 = vpop.f32.mrf.mxu0 }
 0x2f2   : > { %v2617_v12 = vpop.f32.mrf.mxu1 }
 0x2f3   : > { %v2716_v23 = vpop.f32.mrf.mxu2  ;;  %v5759_v27 = vadd.f32 %v2617_v12, %v2513_v41 }
 0x2f4   : > { %v2735_v22 = vadd.f32 %v2716_v23, %v2621_v62  ;;  %v2828_v14 = vpop.f32.mrf.mxu3 }
 0x2f5   : > { %v2848_v40 = vadd.f32 %v2828_v14, %v2734_v26 }
 0x2f7   : > { %v2945_v32 = vpop.f32.mrf.mxu0  ;;  %v2963_v5 = vadd.f32 %v2943_v0, %v2848_v40 }
 0x2fa   : > { %v3057_v45 = vpop.f32.mrf.mxu1 }
 0x2fb   : > { %v2719_v55 = vpop.f32.mrf.mxu2  ;;  %v3077_v33 = vadd.f32 %v3057_v45, %v2963_v5 }
 0x2fc   : > { %v2830_v3 = vpop.f32.mrf.mxu3  ;;  %v2736_v58 = vadd.f32 %v2719_v55, %v2622_v16  ;;  %v5774_v16 = vld [vmem:[%s5820_s7] ss:$0 sm:$0xff] }
 0x2fd   : > { %v2849_v35 = vadd.f32 %v2830_v3, %v2735_v22 }
 0x2ff   : > { %v2948_v8 = vpop.f32.mrf.mxu0  ;;  %v2964_v23 = vadd.f32 %v2945_v32, %v2849_v35 }
 0x302   : > { %v5761_v28 = vpop.f32.mrf.mxu1 }
 0x303   : > { %v2721_v19 = vpop.f32.mrf.mxu2  ;;  %v3078_v0 = vadd.f32 %v5761_v28, %v2964_v23 }
 0x304   : > { %v2833_v6 = vpop.f32.mrf.mxu3  ;;  %v2737_v57 = vadd.f32 %v2721_v19, %v2623_v60 }
 0x305   : > { %v2850_v62 = vadd.f32 %v2833_v6, %v2736_v58 }
 0x307   : > { %v2950_v56 = vpop.f32.mrf.mxu0  ;;  %v2965_v54 = vadd.f32 %v2948_v8, %v2850_v62 }
 0x30a   : > { %v3062_v49 = vpop.f32.mrf.mxu1 }
 0x30b   : > { %v2724_v43 = vpop.f32.mrf.mxu2  ;;  %v3079_v18 = vadd.f32 %v3062_v49, %v2965_v54 }
 0x30c   : > { %v2835_v44 = vpop.f32.mrf.mxu3  ;;  %v2738_v39 = vadd.f32 %v2724_v43, %v2624_v21 }
 0x30d   : > { %v2851_v31 = vadd.f32 %v2835_v44, %v2737_v57 }
 0x30f   : > { %v2953_v48 = vpop.f32.mrf.mxu0  ;;  %v2966_v30 = vadd.f32 %v2950_v56, %v2851_v31 }
 0x312   : > { %v3064_v7 = vpop.f32.mrf.mxu1 }
 0x313   : > { %v2726_v11 = vpop.f32.mrf.mxu2  ;;  %v3080_v42 = vadd.f32 %v3064_v7, %v2966_v30 }
 0x314   : > { %v2838_v29 = vpop.f32.mrf.mxu3  ;;  %v2739_v37 = vadd.f32 %v2726_v11, %v5755_v25 }
 0x315   : > { %v2852_v1 = vadd.f32 %v2838_v29, %v2738_v39 }
 0x317   : > { %v2967_v10 = vadd.f32 %v2953_v48, %v2852_v1  ;;  %v2955_v4 = vpop.f32.mrf.mxu0 }
 0x31a   : > { %v3067_v34 = vpop.f32.mrf.mxu1 }
 0x31b   : > { %v2729_v51 = vpop.f32.mrf.mxu2  ;;  %v3081_v17 = vadd.f32 %v3067_v34, %v2967_v10 }
 0x31c   : > { %v2840_v47 = vpop.f32.mrf.mxu3  ;;  %v2740_v19 = vadd.f32 %v2729_v51, %v5757_v63 }
 0x31d   : > { %v2853_v53 = vadd.f32 %v2840_v47, %v2739_v37 }
 0x31f   : > { %v2968_v55 = vadd.f32 %v2955_v4, %v2853_v53  ;;  %v2958_v3 = vpop.f32.mrf.mxu0 }
 0x322   : > { %v3069_v13 = vpop.f32.mrf.mxu1 }
 0x323   : > { %v5763_v59 = vpop.f32.mrf.mxu2  ;;  %v3082_v49 = vadd.f32 %v3069_v13, %v2968_v55 }
 0x324   : > { %v2843_v12 = vpop.f32.mrf.mxu3  ;;  %v2741_v28 = vadd.f32 %v5763_v59, %v5759_v27 }
 0x325   : > { %v2854_v43 = vadd.f32 %v2843_v12, %v2740_v19 }
 0x327   : > { %v2969_v8 = vadd.f32 %v2958_v3, %v2854_v43  ;;  %v2960_v57 = vpop.f32.mrf.mxu0 }
 0x32a   : > { %v3072_v2 = vpop.f32.mrf.mxu1 }
 0x32b   : > { %v3176_v38 = vpop.f32.mrf.mxu2  ;;  %v3083_v62 = vadd.f32 %v3072_v2, %v2969_v8 }
 0x32c   : > { %v3193_v24 = vadd.f32 %v3176_v38, %v3079_v18  ;;  %v2845_v51 = vpop.f32.mrf.mxu3 }
 0x32d   : > { %v2855_v13 = vadd.f32 %v2845_v51, %v2741_v28 }
 0x32e   : > { %v3205_v60 = vmul.f32 %v5768_v52, %v3193_v24 }
 0x32f   : > { %v2970_v29 = vadd.f32 %v2960_v57, %v2855_v13 }
 0x330   : > { %v3217_v36 = vadd.f32 %v5774_v16, %v3205_v60 }
 0x332   : > { %3225 = vst [vmem:[%s5780_s16 + $0x10] sm:$0xff] %v3217_v36  ;;  %v3074_v15 = vpop.f32.mrf.mxu1 }
 0x333   : > { %v3178_v20 = vpop.f32.mrf.mxu2  ;;  %v3084_v38 = vadd.f32 %v3074_v15, %v2970_v29 }
 0x334   : > { %v3194_v50 = vadd.f32 %v3178_v20, %v3080_v42 }
 0x336   : > { %v3206_v9 = vmul.f32 %v5768_v52, %v3194_v50 }
 0x338   : > { %v3218_v21 = vadd.f32 %v5774_v16, %v3206_v9 }
 0x33a   : > { %3226 = vst [vmem:[%s5780_s16 + $0x18] sm:$0xff] %v3218_v21  ;;  %v3171_v26 = vpop.f32.mrf.mxu1 }
 0x33b   : > { %v3181_v61 = vpop.f32.mrf.mxu2  ;;  %v3191_v46 = vadd.f32 %v3171_v26, %v3077_v33 }
 0x33c   : > { %v3195_v41 = vadd.f32 %v3181_v61, %v3081_v17 }
 0x33d   : > { %v3203_v14 = vmul.f32 %v5768_v52, %v3191_v46 }
 0x33e   : > { %v3207_v25 = vmul.f32 %v5768_v52, %v3195_v41 }
 0x33f   : > { %v3215_v22 = vadd.f32 %v5774_v16, %v3203_v14 }
 0x340   : > { %v3219_v45 = vadd.f32 %v5774_v16, %v3207_v25 }
 0x341   : > { %3223 = vst [vmem:[%s5780_s16] sm:$0xff] %v3215_v22 }
 0x342   : > { %v3173_v32 = vpop.f32.mrf.mxu1  ;;  %3227 = vst [vmem:[%s5780_s16 + $0x20] sm:$0xff] %v3219_v45 }
 0x343   : > { %v3183_v7 = vpop.f32.mrf.mxu2  ;;  %v3192_v11 = vadd.f32 %v3173_v32, %v3078_v0 }
 0x344   : > { %v3196_v6 = vadd.f32 %v3183_v7, %v3082_v49 }
 0x345   : > { %v3204_v63 = vmul.f32 %v5768_v52, %v3192_v11 }
 0x346   : > { %v3208_v34 = vmul.f32 %v5768_v52, %v3196_v6 }
 0x347   : > { %v3216_v44 = vadd.f32 %v5774_v16, %v3204_v63 }
 0x348   : > { %v3220_v58 = vadd.f32 %v5774_v16, %v3208_v34 }
 0x349   : > { %3224 = vst [vmem:[%s5780_s16 + $0x8] sm:$0xff] %v3216_v44 }
 0x34a   : > { %3228 = vst [vmem:[%s5780_s16 + $0x28] sm:$0xff] %v3220_v58 }
 0x34b   : > { %v3186_v56 = vpop.f32.mrf.mxu2 }
 0x34c   : > { %v3197_v54 = vadd.f32 %v3186_v56, %v3083_v62 }
 0x34e   : > { %v3209_v18 = vmul.f32 %v5768_v52, %v3197_v54 }
 0x350   : > { %v3221_v31 = vadd.f32 %v5774_v16, %v3209_v18 }
 0x352   : > { %3229 = vst [vmem:[%s5780_s16 + $0x30] sm:$0xff] %v3221_v31 }
 0x353   : > { %v3188_v27 = vpop.f32.mrf.mxu2 }
 0x354   : > { %v3198_v59 = vadd.f32 %v3188_v27, %v3084_v38 }
 0x356   : > { %v3210_v24 = vmul.f32 %v5768_v52, %v3198_v59 }
 0x358   : > { %v3222_v2 = vadd.f32 %v5774_v16, %v3210_v24 }
 0x35a   : > { %3230 = vst [vmem:[%s5780_s16 + $0x38] sm:$0xff] %v3222_v2 }
 0x35b PF: > { %s18_s27 = sadd.s32 1, %s4394_s27  }
 0x35c   : > { %p15_p4 = scmp.ge.s32.totalorder %s18_s27, 4  }
 0x35e   :  { %17 = sbr.rel (!%p15_p4) target bundleno = 1 (0x1), region = 102 }

</bundles_post_ra>
